<compile_context>
chip_gen: v7x
topology: tpu7x:2x2x1
jax: 0.10.0
libtpu: 0.0.40
codegen_flags: <defaults>
</compile_context>

<pallas_src>
import math

import jax
import jax.numpy as jnp
from jax.experimental import pallas as pl
from jax.experimental.pallas import tpu as pltpu


# ----------------------------- config (small, synthetic) ---------------------
BATCH = 2
SEQ = 8
HIDDEN = 32
N_HEADS = 2
HEAD_DIM = HIDDEN // N_HEADS
INTERMEDIATE = 64
N_LAYERS = 2
VOCAB = 99
VOCAB_PAD = 128           # lane-aligned vocab for the one-hot MXU gather
MAX_POS = 16
N_CLASSES = 3
LN_EPS = 1e-12

SLAB_COLS = 128           # lane width of the packed weight slab


# ----------------------------- slab layout ------------------------------------
def _build_layout():
    """Static (row_offset, n_rows, n_cols) for every parameter in the slab."""
    entries = [
        ("word_emb", VOCAB_PAD, HIDDEN),
        ("static_emb", BATCH * SEQ, HIDDEN),
        ("emb_ln_g", 1, HIDDEN),
        ("emb_ln_b", 1, HIDDEN),
    ]
    for l in range(N_LAYERS):
        entries += [
            (f"wqkv{l}", HIDDEN, 3 * HIDDEN),
            (f"bqkv{l}", 1, 3 * HIDDEN),
            (f"wo{l}", HIDDEN, HIDDEN),
            (f"bo{l}", 1, HIDDEN),
            (f"ln1_g{l}", 1, HIDDEN),
            (f"ln1_b{l}", 1, HIDDEN),
            (f"wi{l}", HIDDEN, INTERMEDIATE),
            (f"bi{l}", 1, INTERMEDIATE),
            (f"wo2{l}", INTERMEDIATE, HIDDEN),
            (f"bo2{l}", 1, HIDDEN),
            (f"ln2_g{l}", 1, HIDDEN),
            (f"ln2_b{l}", 1, HIDDEN),
        ]
    entries += [
        ("pool_w", HIDDEN, HIDDEN),
        ("pool_b", 1, HIDDEN),
        ("cls_w", HIDDEN, N_CLASSES),
        ("cls_b", 1, N_CLASSES),
    ]
    layout, off = {}, 0
    for name, nr, nc in entries:
        layout[name] = (off, nr, nc)
        off += ((nr + 7) // 8) * 8          # keep every entry 8-row (sublane) aligned
    total_rows = ((off + 7) // 8) * 8
    return layout, total_rows


SLAB_LAYOUT, SLAB_ROWS = _build_layout()


def _gelu_tanh(x):
    # tanh-approximation GELU (EUP friendly); BERT's exact-erf gelu differs by <1e-3.
    c = math.sqrt(2.0 / math.pi)
    return 0.5 * x * (1.0 + jnp.tanh(c * (x + 0.044715 * x * x * x)))


# ----------------------------- fused forward kernel ---------------------------
def _fused_forward_kernel(ids_ref, add_mask_ref, slab_ref, logits_ref, ctx_scratch):
    BS = BATCH * SEQ

    def w(name):                                   # bf16 weight slice (MXU operand)
        off, nr, nc = SLAB_LAYOUT[name]
        return slab_ref[off:off + nr, 0:nc]

    def wf32(name):                                # f32 copy (bias / LN / additive use)
        return w(name).astype(jnp.float32)

    def layer_norm(x, gname, bname):
        mu = jnp.mean(x, axis=-1, keepdims=True)
        var = jnp.mean((x - mu) * (x - mu), axis=-1, keepdims=True)
        return (x - mu) * jax.lax.rsqrt(var + LN_EPS) * wf32(gname) + wf32(bname)

    # ---- embeddings: one-hot gather on the MXU + (pos + type) slab + LN ----
    ids = ids_ref[...]                                                # (BS, 1) int32
    iota = jax.lax.broadcasted_iota(jnp.int32, (BS, VOCAB_PAD), 1)    # (BS, 128)
    onehot = jnp.where(iota == ids, 1.0, 0.0).astype(jnp.bfloat16)
    word = jnp.dot(onehot, w("word_emb"),
                   preferred_element_type=jnp.float32)                # (BS, H) f32
    h = layer_norm(word + wf32("static_emb"), "emb_ln_g", "emb_ln_b")

    add_mask = add_mask_ref[...]                                      # (B, S) f32
    scale = 1.0 / math.sqrt(HEAD_DIM)

    for l in range(N_LAYERS):
        # --- self-attention: fused QKV projection ---
        qkv = jnp.dot(h.astype(jnp.bfloat16), w(f"wqkv{l}"),
                      preferred_element_type=jnp.float32) + wf32(f"bqkv{l}")
        q = qkv[:, 0:HIDDEN]
        k = qkv[:, HIDDEN:2 * HIDDEN]
        v = qkv[:, 2 * HIDDEN:3 * HIDDEN]

        # all B*nH heads, fully unrolled; head outputs stored at static offsets
        # into the resident VMEM scratch (no lane/sublane concats).
        for b in range(BATCH):
            r0 = b * SEQ
            mb = add_mask[b:b + 1, :]          # (1, S) key mask, broadcast over queries
            for hd in range(N_HEADS):
                c0 = hd * HEAD_DIM
                qh = q[r0:r0 + SEQ, c0:c0 + HEAD_DIM]
                kh = k[r0:r0 + SEQ, c0:c0 + HEAD_DIM]
                vh = v[r0:r0 + SEQ, c0:c0 + HEAD_DIM]
                s = jnp.dot(qh, kh.T, preferred_element_type=jnp.float32) * scale + mb
                # keep the max-subtraction: fully-masked rows stay finite (PyTorch-like)
                s = s - jnp.max(s, axis=-1, keepdims=True)
                p = jnp.exp(s)
                p = p * pl.reciprocal(jnp.sum(p, axis=-1, keepdims=True), approx=True)
                ctx_scratch[r0:r0 + SEQ, c0:c0 + HEAD_DIM] = jnp.dot(
                    p, vh, preferred_element_type=jnp.float32)
        ctx = ctx_scratch[...]                                        # (BS, H) f32

        attn_out = jnp.dot(ctx.astype(jnp.bfloat16), w(f"wo{l}"),
                           preferred_element_type=jnp.float32) + wf32(f"bo{l}")
        h = layer_norm(attn_out + h, f"ln1_g{l}", f"ln1_b{l}")

        # --- feed-forward ---
        ffn = jnp.dot(h.astype(jnp.bfloat16), w(f"wi{l}"),
                      preferred_element_type=jnp.float32) + wf32(f"bi{l}")
        ffn = _gelu_tanh(ffn)
        ffn_out = jnp.dot(ffn.astype(jnp.bfloat16), w(f"wo2{l}"),
                          preferred_element_type=jnp.float32) + wf32(f"bo2{l}")
        h = layer_norm(ffn_out + h, f"ln2_g{l}", f"ln2_b{l}")

    # --- pooler + classifier on ALL rows (same MXU pass count at H=32),
    #     then static row stores of the [CLS] rows only ---
    pooled = jnp.tanh(jnp.dot(h.astype(jnp.bfloat16), w("pool_w"),
                              preferred_element_type=jnp.float32) + wf32("pool_b"))
    # dropout(p=0.3): identity at inference time.
    # TODO(synk): training-mode dropout would use pltpu.prng_seed/stateful_bernoulli.
    logits_all = jnp.dot(pooled.astype(jnp.bfloat16), w("cls_w"),
                         preferred_element_type=jnp.float32) + wf32("cls_b")

    for b in range(BATCH):
        logits_ref[b:b + 1, :] = logits_all[b * SEQ:b * SEQ + 1, :].astype(logits_ref.dtype)


# ----------------------------- parameter construction ------------------------
def init_params(key):
    p = {}
    ks = iter(jax.random.split(key, 256))
    std = 0.02

    def nrm(shape):
        return std * jax.random.normal(next(ks), shape, dtype=jnp.float32)

    p["word_emb"] = nrm((VOCAB, HIDDEN))
    p["pos_emb"] = nrm((MAX_POS, HIDDEN))
    p["type_emb"] = nrm((2, HIDDEN))
    p["emb_ln_g"] = jnp.ones((HIDDEN,), jnp.float32)
    p["emb_ln_b"] = jnp.zeros((HIDDEN,), jnp.float32)

    layers = []
    for _ in range(N_LAYERS):
        layers.append({
            "wq": nrm((HIDDEN, HIDDEN)), "bq": jnp.zeros((HIDDEN,), jnp.float32),
            "wk": nrm((HIDDEN, HIDDEN)), "bk": jnp.zeros((HIDDEN,), jnp.float32),
            "wv": nrm((HIDDEN, HIDDEN)), "bv": jnp.zeros((HIDDEN,), jnp.float32),
            "wo": nrm((HIDDEN, HIDDEN)), "bo": jnp.zeros((HIDDEN,), jnp.float32),
            "ln1_g": jnp.ones((HIDDEN,), jnp.float32),
            "ln1_b": jnp.zeros((HIDDEN,), jnp.float32),
            "wi": nrm((HIDDEN, INTERMEDIATE)),
            "bi": jnp.zeros((INTERMEDIATE,), jnp.float32),
            "wo2": nrm((INTERMEDIATE, HIDDEN)),
            "bo2": jnp.zeros((HIDDEN,), jnp.float32),
            "ln2_g": jnp.ones((HIDDEN,), jnp.float32),
            "ln2_b": jnp.zeros((HIDDEN,), jnp.float32),
        })
    p["layers"] = layers

    p["pool_w"] = nrm((HIDDEN, HIDDEN))
    p["pool_b"] = jnp.zeros((HIDDEN,), jnp.float32)
    p["cls_w"] = nrm((HIDDEN, N_CLASSES))
    p["cls_b"] = jnp.zeros((N_CLASSES,), jnp.float32)
    return p


def pack_params(p, seq_len):
    """One-time packing of ALL weights into a single (SLAB_ROWS, 128) bf16 slab."""
    L = p["layers"]
    entries = {
        # lane-padded vocab for the one-hot MXU gather
        "word_emb": jnp.zeros((VOCAB_PAD, HIDDEN), jnp.float32).at[:VOCAB].set(
            p["word_emb"]),
        # static additive (position + token-type-0) embedding, tiled over batch
        "static_emb": jnp.tile(p["pos_emb"][:seq_len] + p["type_emb"][0][None, :],
                               (BATCH, 1)),
        "emb_ln_g": p["emb_ln_g"].reshape(1, HIDDEN),
        "emb_ln_b": p["emb_ln_b"].reshape(1, HIDDEN),
        "pool_w": p["pool_w"],
        "pool_b": p["pool_b"].reshape(1, HIDDEN),
        "cls_w": p["cls_w"],
        "cls_b": p["cls_b"].reshape(1, N_CLASSES),
    }
    for l, lyr in enumerate(L):
        entries[f"wqkv{l}"] = jnp.concatenate([lyr["wq"], lyr["wk"], lyr["wv"]], axis=1)
        entries[f"bqkv{l}"] = jnp.concatenate([lyr["bq"], lyr["bk"], lyr["bv"]])[None, :]
        entries[f"wo{l}"] = lyr["wo"]
        entries[f"bo{l}"] = lyr["bo"][None, :]
        entries[f"ln1_g{l}"] = lyr["ln1_g"][None, :]
        entries[f"ln1_b{l}"] = lyr["ln1_b"][None, :]
        entries[f"wi{l}"] = lyr["wi"]
        entries[f"bi{l}"] = lyr["bi"][None, :]
        entries[f"wo2{l}"] = lyr["wo2"]
        entries[f"bo2{l}"] = lyr["bo2"][None, :]
        entries[f"ln2_g{l}"] = lyr["ln2_g"][None, :]
        entries[f"ln2_b{l}"] = lyr["ln2_b"][None, :]

    slab = jnp.zeros((SLAB_ROWS, SLAB_COLS), jnp.float32)
    for name, (off, nr, nc) in SLAB_LAYOUT.items():
        slab = slab.at[off:off + nr, 0:nc].set(entries[name])
    return slab.astype(jnp.bfloat16)


# ----------------------------- forward pass -----------------------------------
def sentiment_classifier_forward(slab, input_ids, attention_mask):
    B, S = input_ids.shape
    ids = input_ids.reshape(B * S, 1).astype(jnp.int32)
    # additive attention mask: 0 where attended, -10000 where masked
    add_mask = (1.0 - attention_mask.astype(jnp.float32)) * -10000.0   # (B, S)

    vmem = pl.BlockSpec(memory_space=pltpu.MemorySpace.VMEM)
    return pl.pallas_call(
        _fused_forward_kernel,
        out_shape=jax.ShapeDtypeStruct((B, N_CLASSES), jnp.float32),
        in_specs=[vmem, vmem, vmem],
        out_specs=vmem,
        scratch_shapes=[pltpu.VMEM((B * S, HIDDEN), jnp.float32)],   # head-merge scratch
    )(ids, add_mask, slab)


# ----------------------------- main -------------------------------------------
if __name__ == "__main__":
    key = jax.random.PRNGKey(0)
    pkey, ikey = jax.random.split(key)

    params = init_params(pkey)
    slab = pack_params(params, SEQ)

    input_ids = jax.random.randint(ikey, (BATCH, SEQ), 0, VOCAB, dtype=jnp.int32)
    attention_mask = jnp.ones((BATCH, SEQ), dtype=jnp.int32)

    logits = sentiment_classifier_forward(slab, input_ids, attention_mask)
    logits = jax.block_until_ready(logits)
    assert logits.shape == (BATCH, N_CLASSES)
    assert bool(jnp.all(jnp.isfinite(logits)))
    print("KERNEL_OK")
</pallas_src>

<mosaic_0001>
module attributes {stable_mosaic.version = 11 : i64} {
  func.func @_fused_forward_kernel(%arg0: memref<16x1xi32, #tpu.memory_space<vmem>>, %arg1: memref<2x8xf32, #tpu.memory_space<vmem>>, %arg2: memref<688x128xbf16, #tpu.memory_space<vmem>>, %arg3: memref<2x3xf32, #tpu.memory_space<vmem>>, %arg4: memref<16x32xf32, #tpu.memory_space<vmem>>) attributes {dimension_semantics = [], scalar_prefetch = 0 : i64, scratch_operands = 1 : i64, tpu.core_type = #tpu.core_type<tc>} {
    %c0 = arith.constant 0 : index
    %c0_0 = arith.constant 0 : index
    %0 = vector.load %arg0[%c0, %c0_0] : memref<16x1xi32, #tpu.memory_space<vmem>>, vector<16x1xi32>
    %1 = tpu.iota {dimensions = array<i32: 1>} : vector<16x128xi32>
    %2 = vector.broadcast %0 : vector<16x1xi32> to vector<16x128xi32>
    %3 = arith.cmpi eq, %1, %2 : vector<16x128xi32>
    %cst = arith.constant 1.000000e+00 : f32
    %cst_1 = arith.constant 0.000000e+00 : f32
    %4 = vector.broadcast %cst : f32 to vector<16x128xf32>
    %5 = vector.broadcast %cst_1 : f32 to vector<16x128xf32>
    %6 = arith.select %3, %4, %5 : vector<16x128xi1>, vector<16x128xf32>
    %7 = arith.truncf %6 : vector<16x128xf32> to vector<16x128xbf16>
    %c0_2 = arith.constant 0 : index
    %c0_3 = arith.constant 0 : index
    %8 = vector.load %arg2[%c0_2, %c0_3] : memref<688x128xbf16, #tpu.memory_space<vmem>>, vector<128x32xbf16>
    %cst_4 = arith.constant dense<0.000000e+00> : vector<16x32xf32>
    %9 = tpu.matmul %7, %8, %cst_4 {dimension_numbers = #tpu.dot_dimension_numbers<[1], [0], [0], [1], [0, 0, 1, 1], [], []>} : vector<16x128xbf16>, vector<128x32xbf16>, vector<16x32xf32> -> vector<16x32xf32>
    %c128 = arith.constant 128 : index
    %c0_5 = arith.constant 0 : index
    %10 = vector.load %arg2[%c128, %c0_5] : memref<688x128xbf16, #tpu.memory_space<vmem>>, vector<16x32xbf16>
    %11 = arith.extf %10 : vector<16x32xbf16> to vector<16x32xf32>
    %12 = arith.addf %9, %11 : vector<16x32xf32>
    %cst_6 = arith.constant dense<0.000000e+00> : vector<16xf32>
    %13 = vector.multi_reduction <add>, %12, %cst_6 [1] : vector<16x32xf32> to vector<16xf32>
    %14 = vector.shape_cast %13 : vector<16xf32> to vector<16x1xf32>
    %cst_7 = arith.constant 3.200000e+01 : f32
    %15 = vector.broadcast %cst_7 : f32 to vector<16x1xf32>
    %16 = arith.divf %14, %15 : vector<16x1xf32>
    %17 = vector.broadcast %16 : vector<16x1xf32> to vector<16x32xf32>
    %18 = arith.subf %12, %17 : vector<16x32xf32>
    %19 = vector.broadcast %16 : vector<16x1xf32> to vector<16x32xf32>
    %20 = arith.subf %12, %19 : vector<16x32xf32>
    %21 = arith.mulf %18, %20 : vector<16x32xf32>
    %cst_8 = arith.constant dense<0.000000e+00> : vector<16xf32>
    %22 = vector.multi_reduction <add>, %21, %cst_8 [1] : vector<16x32xf32> to vector<16xf32>
    %23 = vector.shape_cast %22 : vector<16xf32> to vector<16x1xf32>
    %cst_9 = arith.constant 3.200000e+01 : f32
    %24 = vector.broadcast %cst_9 : f32 to vector<16x1xf32>
    %25 = arith.divf %23, %24 : vector<16x1xf32>
    %26 = vector.broadcast %16 : vector<16x1xf32> to vector<16x32xf32>
    %27 = arith.subf %12, %26 : vector<16x32xf32>
    %cst_10 = arith.constant 9.99999996E-13 : f32
    %28 = vector.broadcast %cst_10 : f32 to vector<16x1xf32>
    %29 = arith.addf %25, %28 : vector<16x1xf32>
    %30 = math.rsqrt %29 : vector<16x1xf32>
    %31 = vector.broadcast %30 : vector<16x1xf32> to vector<16x32xf32>
    %32 = arith.mulf %27, %31 : vector<16x32xf32>
    %c144 = arith.constant 144 : index
    %c0_11 = arith.constant 0 : index
    %33 = vector.load %arg2[%c144, %c0_11] : memref<688x128xbf16, #tpu.memory_space<vmem>>, vector<1x32xbf16>
    %34 = arith.extf %33 : vector<1x32xbf16> to vector<1x32xf32>
    %35 = vector.broadcast %34 : vector<1x32xf32> to vector<16x32xf32>
    %36 = arith.mulf %32, %35 : vector<16x32xf32>
    %c152 = arith.constant 152 : index
    %c0_12 = arith.constant 0 : index
    %37 = vector.load %arg2[%c152, %c0_12] : memref<688x128xbf16, #tpu.memory_space<vmem>>, vector<1x32xbf16>
    %38 = arith.extf %37 : vector<1x32xbf16> to vector<1x32xf32>
    %39 = vector.broadcast %38 : vector<1x32xf32> to vector<16x32xf32>
    %40 = arith.addf %36, %39 : vector<16x32xf32>
    %c0_13 = arith.constant 0 : index
    %c0_14 = arith.constant 0 : index
    %41 = vector.load %arg1[%c0_13, %c0_14] : memref<2x8xf32, #tpu.memory_space<vmem>>, vector<2x8xf32>
    %42 = arith.truncf %40 : vector<16x32xf32> to vector<16x32xbf16>
    %c160 = arith.constant 160 : index
    %c0_15 = arith.constant 0 : index
    %43 = vector.load %arg2[%c160, %c0_15] : memref<688x128xbf16, #tpu.memory_space<vmem>>, vector<32x96xbf16>
    %cst_16 = arith.constant dense<0.000000e+00> : vector<16x96xf32>
    %44 = tpu.matmul %42, %43, %cst_16 {dimension_numbers = #tpu.dot_dimension_numbers<[1], [0], [0], [1], [0, 0, 1, 1], [], []>} : vector<16x32xbf16>, vector<32x96xbf16>, vector<16x96xf32> -> vector<16x96xf32>
    %c192 = arith.constant 192 : index
    %c0_17 = arith.constant 0 : index
    %45 = vector.load %arg2[%c192, %c0_17] : memref<688x128xbf16, #tpu.memory_space<vmem>>, vector<1x96xbf16>
    %46 = arith.extf %45 : vector<1x96xbf16> to vector<1x96xf32>
    %47 = vector.broadcast %46 : vector<1x96xf32> to vector<16x96xf32>
    %48 = arith.addf %44, %47 : vector<16x96xf32>
    %49 = vector.extract_strided_slice %48 {offsets = [0, 0], sizes = [16, 32], strides = [1, 1]} : vector<16x96xf32> to vector<16x32xf32>
    %50 = vector.extract_strided_slice %48 {offsets = [0, 32], sizes = [16, 32], strides = [1, 1]} : vector<16x96xf32> to vector<16x32xf32>
    %51 = vector.extract_strided_slice %48 {offsets = [0, 64], sizes = [16, 32], strides = [1, 1]} : vector<16x96xf32> to vector<16x32xf32>
    %52 = vector.extract_strided_slice %41 {offsets = [0, 0], sizes = [1, 8], strides = [1, 1]} : vector<2x8xf32> to vector<1x8xf32>
    %53 = vector.extract_strided_slice %49 {offsets = [0, 0], sizes = [8, 16], strides = [1, 1]} : vector<16x32xf32> to vector<8x16xf32>
    %54 = vector.extract_strided_slice %50 {offsets = [0, 0], sizes = [8, 16], strides = [1, 1]} : vector<16x32xf32> to vector<8x16xf32>
    %55 = vector.extract_strided_slice %51 {offsets = [0, 0], sizes = [8, 16], strides = [1, 1]} : vector<16x32xf32> to vector<8x16xf32>
    %56 = tpu.transpose %54, [1, 0] : vector<8x16xf32> -> vector<16x8xf32>
    %cst_18 = arith.constant dense<0.000000e+00> : vector<8x8xf32>
    %57 = tpu.matmul %53, %56, %cst_18 {dimension_numbers = #tpu.dot_dimension_numbers<[1], [0], [0], [1], [0, 0, 1, 1], [], []>} : vector<8x16xf32>, vector<16x8xf32>, vector<8x8xf32> -> vector<8x8xf32>
    %cst_19 = arith.constant 2.500000e-01 : f32
    %58 = vector.broadcast %cst_19 : f32 to vector<8x8xf32>
    %59 = arith.mulf %57, %58 : vector<8x8xf32>
    %60 = vector.broadcast %52 : vector<1x8xf32> to vector<8x8xf32>
    %61 = arith.addf %59, %60 : vector<8x8xf32>
    %cst_20 = arith.constant dense<0xFF800000> : vector<8xf32>
    %62 = vector.multi_reduction <maximumf>, %61, %cst_20 [1] : vector<8x8xf32> to vector<8xf32>
    %63 = vector.shape_cast %62 : vector<8xf32> to vector<8x1xf32>
    %64 = vector.broadcast %63 : vector<8x1xf32> to vector<8x8xf32>
    %65 = arith.subf %61, %64 : vector<8x8xf32>
    %66 = math.exp %65 : vector<8x8xf32>
    %cst_21 = arith.constant dense<0.000000e+00> : vector<8xf32>
    %67 = vector.multi_reduction <add>, %66, %cst_21 [1] : vector<8x8xf32> to vector<8xf32>
    %68 = vector.shape_cast %67 : vector<8xf32> to vector<8x1xf32>
    %69 = tpu.reciprocal %68 {approx = true} : vector<8x1xf32> -> vector<8x1xf32>
    %70 = vector.broadcast %69 : vector<8x1xf32> to vector<8x8xf32>
    %71 = arith.mulf %66, %70 : vector<8x8xf32>
    %cst_22 = arith.constant dense<0.000000e+00> : vector<8x16xf32>
    %72 = tpu.matmul %71, %55, %cst_22 {dimension_numbers = #tpu.dot_dimension_numbers<[1], [0], [0], [1], [0, 0, 1, 1], [], []>} : vector<8x8xf32>, vector<8x16xf32>, vector<8x16xf32> -> vector<8x16xf32>
    %c0_23 = arith.constant 0 : index
    %c0_24 = arith.constant 0 : index
    %73 = vector.load %arg4[%c0_23, %c0_24] : memref<16x32xf32, #tpu.memory_space<vmem>>, vector<8x16xf32>
    tpu.vector_store %arg4[%c0_23, %c0_24], %72 {strides = array<i32>} : memref<16x32xf32, #tpu.memory_space<vmem>>, vector<8x16xf32>,
    %74 = vector.extract_strided_slice %49 {offsets = [0, 16], sizes = [8, 16], strides = [1, 1]} : vector<16x32xf32> to vector<8x16xf32>
    %75 = vector.extract_strided_slice %50 {offsets = [0, 16], sizes = [8, 16], strides = [1, 1]} : vector<16x32xf32> to vector<8x16xf32>
    %76 = vector.extract_strided_slice %51 {offsets = [0, 16], sizes = [8, 16], strides = [1, 1]} : vector<16x32xf32> to vector<8x16xf32>
    %77 = tpu.transpose %75, [1, 0] : vector<8x16xf32> -> vector<16x8xf32>
    %cst_25 = arith.constant dense<0.000000e+00> : vector<8x8xf32>
    %78 = tpu.matmul %74, %77, %cst_25 {dimension_numbers = #tpu.dot_dimension_numbers<[1], [0], [0], [1], [0, 0, 1, 1], [], []>} : vector<8x16xf32>, vector<16x8xf32>, vector<8x8xf32> -> vector<8x8xf32>
    %cst_26 = arith.constant 2.500000e-01 : f32
    %79 = vector.broadcast %cst_26 : f32 to vector<8x8xf32>
    %80 = arith.mulf %78, %79 : vector<8x8xf32>
    %81 = vector.broadcast %52 : vector<1x8xf32> to vector<8x8xf32>
    %82 = arith.addf %80, %81 : vector<8x8xf32>
    %cst_27 = arith.constant dense<0xFF800000> : vector<8xf32>
    %83 = vector.multi_reduction <maximumf>, %82, %cst_27 [1] : vector<8x8xf32> to vector<8xf32>
    %84 = vector.shape_cast %83 : vector<8xf32> to vector<8x1xf32>
    %85 = vector.broadcast %84 : vector<8x1xf32> to vector<8x8xf32>
    %86 = arith.subf %82, %85 : vector<8x8xf32>
    %87 = math.exp %86 : vector<8x8xf32>
    %cst_28 = arith.constant dense<0.000000e+00> : vector<8xf32>
    %88 = vector.multi_reduction <add>, %87, %cst_28 [1] : vector<8x8xf32> to vector<8xf32>
    %89 = vector.shape_cast %88 : vector<8xf32> to vector<8x1xf32>
    %90 = tpu.reciprocal %89 {approx = true} : vector<8x1xf32> -> vector<8x1xf32>
    %91 = vector.broadcast %90 : vector<8x1xf32> to vector<8x8xf32>
    %92 = arith.mulf %87, %91 : vector<8x8xf32>
    %cst_29 = arith.constant dense<0.000000e+00> : vector<8x16xf32>
    %93 = tpu.matmul %92, %76, %cst_29 {dimension_numbers = #tpu.dot_dimension_numbers<[1], [0], [0], [1], [0, 0, 1, 1], [], []>} : vector<8x8xf32>, vector<8x16xf32>, vector<8x16xf32> -> vector<8x16xf32>
    %c0_30 = arith.constant 0 : index
    %c16 = arith.constant 16 : index
    %94 = vector.load %arg4[%c0_30, %c16] : memref<16x32xf32, #tpu.memory_space<vmem>>, vector<8x16xf32>
    tpu.vector_store %arg4[%c0_30, %c16], %93 {strides = array<i32>} : memref<16x32xf32, #tpu.memory_space<vmem>>, vector<8x16xf32>,
    %95 = vector.extract_strided_slice %41 {offsets = [1, 0], sizes = [1, 8], strides = [1, 1]} : vector<2x8xf32> to vector<1x8xf32>
    %96 = vector.extract_strided_slice %49 {offsets = [8, 0], sizes = [8, 16], strides = [1, 1]} : vector<16x32xf32> to vector<8x16xf32>
    %97 = vector.extract_strided_slice %50 {offsets = [8, 0], sizes = [8, 16], strides = [1, 1]} : vector<16x32xf32> to vector<8x16xf32>
    %98 = vector.extract_strided_slice %51 {offsets = [8, 0], sizes = [8, 16], strides = [1, 1]} : vector<16x32xf32> to vector<8x16xf32>
    %99 = tpu.transpose %97, [1, 0] : vector<8x16xf32> -> vector<16x8xf32>
    %cst_31 = arith.constant dense<0.000000e+00> : vector<8x8xf32>
    %100 = tpu.matmul %96, %99, %cst_31 {dimension_numbers = #tpu.dot_dimension_numbers<[1], [0], [0], [1], [0, 0, 1, 1], [], []>} : vector<8x16xf32>, vector<16x8xf32>, vector<8x8xf32> -> vector<8x8xf32>
    %cst_32 = arith.constant 2.500000e-01 : f32
    %101 = vector.broadcast %cst_32 : f32 to vector<8x8xf32>
    %102 = arith.mulf %100, %101 : vector<8x8xf32>
    %103 = vector.broadcast %95 : vector<1x8xf32> to vector<8x8xf32>
    %104 = arith.addf %102, %103 : vector<8x8xf32>
    %cst_33 = arith.constant dense<0xFF800000> : vector<8xf32>
    %105 = vector.multi_reduction <maximumf>, %104, %cst_33 [1] : vector<8x8xf32> to vector<8xf32>
    %106 = vector.shape_cast %105 : vector<8xf32> to vector<8x1xf32>
    %107 = vector.broadcast %106 : vector<8x1xf32> to vector<8x8xf32>
    %108 = arith.subf %104, %107 : vector<8x8xf32>
    %109 = math.exp %108 : vector<8x8xf32>
    %cst_34 = arith.constant dense<0.000000e+00> : vector<8xf32>
    %110 = vector.multi_reduction <add>, %109, %cst_34 [1] : vector<8x8xf32> to vector<8xf32>
    %111 = vector.shape_cast %110 : vector<8xf32> to vector<8x1xf32>
    %112 = tpu.reciprocal %111 {approx = true} : vector<8x1xf32> -> vector<8x1xf32>
    %113 = vector.broadcast %112 : vector<8x1xf32> to vector<8x8xf32>
    %114 = arith.mulf %109, %113 : vector<8x8xf32>
    %cst_35 = arith.constant dense<0.000000e+00> : vector<8x16xf32>
    %115 = tpu.matmul %114, %98, %cst_35 {dimension_numbers = #tpu.dot_dimension_numbers<[1], [0], [0], [1], [0, 0, 1, 1], [], []>} : vector<8x8xf32>, vector<8x16xf32>, vector<8x16xf32> -> vector<8x16xf32>
    %c8 = arith.constant 8 : index
    %c0_36 = arith.constant 0 : index
    %116 = vector.load %arg4[%c8, %c0_36] : memref<16x32xf32, #tpu.memory_space<vmem>>, vector<8x16xf32>
    tpu.vector_store %arg4[%c8, %c0_36], %115 {strides = array<i32>} : memref<16x32xf32, #tpu.memory_space<vmem>>, vector<8x16xf32>,
    %117 = vector.extract_strided_slice %49 {offsets = [8, 16], sizes = [8, 16], strides = [1, 1]} : vector<16x32xf32> to vector<8x16xf32>
    %118 = vector.extract_strided_slice %50 {offsets = [8, 16], sizes = [8, 16], strides = [1, 1]} : vector<16x32xf32> to vector<8x16xf32>
    %119 = vector.extract_strided_slice %51 {offsets = [8, 16], sizes = [8, 16], strides = [1, 1]} : vector<16x32xf32> to vector<8x16xf32>
    %120 = tpu.transpose %118, [1, 0] : vector<8x16xf32> -> vector<16x8xf32>
    %cst_37 = arith.constant dense<0.000000e+00> : vector<8x8xf32>
    %121 = tpu.matmul %117, %120, %cst_37 {dimension_numbers = #tpu.dot_dimension_numbers<[1], [0], [0], [1], [0, 0, 1, 1], [], []>} : vector<8x16xf32>, vector<16x8xf32>, vector<8x8xf32> -> vector<8x8xf32>
    %cst_38 = arith.constant 2.500000e-01 : f32
    %122 = vector.broadcast %cst_38 : f32 to vector<8x8xf32>
    %123 = arith.mulf %121, %122 : vector<8x8xf32>
    %124 = vector.broadcast %95 : vector<1x8xf32> to vector<8x8xf32>
    %125 = arith.addf %123, %124 : vector<8x8xf32>
    %cst_39 = arith.constant dense<0xFF800000> : vector<8xf32>
    %126 = vector.multi_reduction <maximumf>, %125, %cst_39 [1] : vector<8x8xf32> to vector<8xf32>
    %127 = vector.shape_cast %126 : vector<8xf32> to vector<8x1xf32>
    %128 = vector.broadcast %127 : vector<8x1xf32> to vector<8x8xf32>
    %129 = arith.subf %125, %128 : vector<8x8xf32>
    %130 = math.exp %129 : vector<8x8xf32>
    %cst_40 = arith.constant dense<0.000000e+00> : vector<8xf32>
    %131 = vector.multi_reduction <add>, %130, %cst_40 [1] : vector<8x8xf32> to vector<8xf32>
    %132 = vector.shape_cast %131 : vector<8xf32> to vector<8x1xf32>
    %133 = tpu.reciprocal %132 {approx = true} : vector<8x1xf32> -> vector<8x1xf32>
    %134 = vector.broadcast %133 : vector<8x1xf32> to vector<8x8xf32>
    %135 = arith.mulf %130, %134 : vector<8x8xf32>
    %cst_41 = arith.constant dense<0.000000e+00> : vector<8x16xf32>
    %136 = tpu.matmul %135, %119, %cst_41 {dimension_numbers = #tpu.dot_dimension_numbers<[1], [0], [0], [1], [0, 0, 1, 1], [], []>} : vector<8x8xf32>, vector<8x16xf32>, vector<8x16xf32> -> vector<8x16xf32>
    %c8_42 = arith.constant 8 : index
    %c16_43 = arith.constant 16 : index
    %137 = vector.load %arg4[%c8_42, %c16_43] : memref<16x32xf32, #tpu.memory_space<vmem>>, vector<8x16xf32>
    tpu.vector_store %arg4[%c8_42, %c16_43], %136 {strides = array<i32>} : memref<16x32xf32, #tpu.memory_space<vmem>>, vector<8x16xf32>,
    %c0_44 = arith.constant 0 : index
    %c0_45 = arith.constant 0 : index
    %138 = vector.load %arg4[%c0_44, %c0_45] : memref<16x32xf32, #tpu.memory_space<vmem>>, vector<16x32xf32>
    %139 = arith.truncf %138 : vector<16x32xf32> to vector<16x32xbf16>
    %c200 = arith.constant 200 : index
    %c0_46 = arith.constant 0 : index
    %140 = vector.load %arg2[%c200, %c0_46] : memref<688x128xbf16, #tpu.memory_space<vmem>>, vector<32x32xbf16>
    %cst_47 = arith.constant dense<0.000000e+00> : vector<16x32xf32>
    %141 = tpu.matmul %139, %140, %cst_47 {dimension_numbers = #tpu.dot_dimension_numbers<[1], [0], [0], [1], [0, 0, 1, 1], [], []>} : vector<16x32xbf16>, vector<32x32xbf16>, vector<16x32xf32> -> vector<16x32xf32>
    %c232 = arith.constant 232 : index
    %c0_48 = arith.constant 0 : index
    %142 = vector.load %arg2[%c232, %c0_48] : memref<688x128xbf16, #tpu.memory_space<vmem>>, vector<1x32xbf16>
    %143 = arith.extf %142 : vector<1x32xbf16> to vector<1x32xf32>
    %144 = vector.broadcast %143 : vector<1x32xf32> to vector<16x32xf32>
    %145 = arith.addf %141, %144 : vector<16x32xf32>
    %146 = arith.addf %145, %40 : vector<16x32xf32>
    %cst_49 = arith.constant dense<0.000000e+00> : vector<16xf32>
    %147 = vector.multi_reduction <add>, %146, %cst_49 [1] : vector<16x32xf32> to vector<16xf32>
    %148 = vector.shape_cast %147 : vector<16xf32> to vector<16x1xf32>
    %cst_50 = arith.constant 3.200000e+01 : f32
    %149 = vector.broadcast %cst_50 : f32 to vector<16x1xf32>
    %150 = arith.divf %148, %149 : vector<16x1xf32>
    %151 = vector.broadcast %150 : vector<16x1xf32> to vector<16x32xf32>
    %152 = arith.subf %146, %151 : vector<16x32xf32>
    %153 = vector.broadcast %150 : vector<16x1xf32> to vector<16x32xf32>
    %154 = arith.subf %146, %153 : vector<16x32xf32>
    %155 = arith.mulf %152, %154 : vector<16x32xf32>
    %cst_51 = arith.constant dense<0.000000e+00> : vector<16xf32>
    %156 = vector.multi_reduction <add>, %155, %cst_51 [1] : vector<16x32xf32> to vector<16xf32>
    %157 = vector.shape_cast %156 : vector<16xf32> to vector<16x1xf32>
    %cst_52 = arith.constant 3.200000e+01 : f32
    %158 = vector.broadcast %cst_52 : f32 to vector<16x1xf32>
    %159 = arith.divf %157, %158 : vector<16x1xf32>
    %160 = vector.broadcast %150 : vector<16x1xf32> to vector<16x32xf32>
    %161 = arith.subf %146, %160 : vector<16x32xf32>
    %cst_53 = arith.constant 9.99999996E-13 : f32
    %162 = vector.broadcast %cst_53 : f32 to vector<16x1xf32>
    %163 = arith.addf %159, %162 : vector<16x1xf32>
    %164 = math.rsqrt %163 : vector<16x1xf32>
    %165 = vector.broadcast %164 : vector<16x1xf32> to vector<16x32xf32>
    %166 = arith.mulf %161, %165 : vector<16x32xf32>
    %c240 = arith.constant 240 : index
    %c0_54 = arith.constant 0 : index
    %167 = vector.load %arg2[%c240, %c0_54] : memref<688x128xbf16, #tpu.memory_space<vmem>>, vector<1x32xbf16>
    %168 = arith.extf %167 : vector<1x32xbf16> to vector<1x32xf32>
    %169 = vector.broadcast %168 : vector<1x32xf32> to vector<16x32xf32>
    %170 = arith.mulf %166, %169 : vector<16x32xf32>
    %c248 = arith.constant 248 : index
    %c0_55 = arith.constant 0 : index
    %171 = vector.load %arg2[%c248, %c0_55] : memref<688x128xbf16, #tpu.memory_space<vmem>>, vector<1x32xbf16>
    %172 = arith.extf %171 : vector<1x32xbf16> to vector<1x32xf32>
    %173 = vector.broadcast %172 : vector<1x32xf32> to vector<16x32xf32>
    %174 = arith.addf %170, %173 : vector<16x32xf32>
    %175 = arith.truncf %174 : vector<16x32xf32> to vector<16x32xbf16>
    %c256 = arith.constant 256 : index
    %c0_56 = arith.constant 0 : index
    %176 = vector.load %arg2[%c256, %c0_56] : memref<688x128xbf16, #tpu.memory_space<vmem>>, vector<32x64xbf16>
    %cst_57 = arith.constant dense<0.000000e+00> : vector<16x64xf32>
    %177 = tpu.matmul %175, %176, %cst_57 {dimension_numbers = #tpu.dot_dimension_numbers<[1], [0], [0], [1], [0, 0, 1, 1], [], []>} : vector<16x32xbf16>, vector<32x64xbf16>, vector<16x64xf32> -> vector<16x64xf32>
    %c288 = arith.constant 288 : index
    %c0_58 = arith.constant 0 : index
    %178 = vector.load %arg2[%c288, %c0_58] : memref<688x128xbf16, #tpu.memory_space<vmem>>, vector<1x64xbf16>
    %179 = arith.extf %178 : vector<1x64xbf16> to vector<1x64xf32>
    %180 = vector.broadcast %179 : vector<1x64xf32> to vector<16x64xf32>
    %181 = arith.addf %177, %180 : vector<16x64xf32>
    %cst_59 = arith.constant 5.000000e-01 : f32
    %182 = vector.broadcast %cst_59 : f32 to vector<16x64xf32>
    %183 = arith.mulf %182, %181 : vector<16x64xf32>
    %cst_60 = arith.constant 4.471500e-02 : f32
    %184 = vector.broadcast %cst_60 : f32 to vector<16x64xf32>
    %185 = arith.mulf %184, %181 : vector<16x64xf32>
    %186 = arith.mulf %185, %181 : vector<16x64xf32>
    %187 = arith.mulf %186, %181 : vector<16x64xf32>
    %188 = arith.addf %181, %187 : vector<16x64xf32>
    %cst_61 = arith.constant 0.797884583 : f32
    %189 = vector.broadcast %cst_61 : f32 to vector<16x64xf32>
    %190 = arith.mulf %189, %188 : vector<16x64xf32>
    %191 = math.tanh %190 : vector<16x64xf32>
    %cst_62 = arith.constant 1.000000e+00 : f32
    %192 = vector.broadcast %cst_62 : f32 to vector<16x64xf32>
    %193 = arith.addf %192, %191 : vector<16x64xf32>
    %194 = arith.mulf %183, %193 : vector<16x64xf32>
    %195 = arith.truncf %194 : vector<16x64xf32> to vector<16x64xbf16>
    %c296 = arith.constant 296 : index
    %c0_63 = arith.constant 0 : index
    %196 = vector.load %arg2[%c296, %c0_63] : memref<688x128xbf16, #tpu.memory_space<vmem>>, vector<64x32xbf16>
    %cst_64 = arith.constant dense<0.000000e+00> : vector<16x32xf32>
    %197 = tpu.matmul %195, %196, %cst_64 {dimension_numbers = #tpu.dot_dimension_numbers<[1], [0], [0], [1], [0, 0, 1, 1], [], []>} : vector<16x64xbf16>, vector<64x32xbf16>, vector<16x32xf32> -> vector<16x32xf32>
    %c360 = arith.constant 360 : index
    %c0_65 = arith.constant 0 : index
    %198 = vector.load %arg2[%c360, %c0_65] : memref<688x128xbf16, #tpu.memory_space<vmem>>, vector<1x32xbf16>
    %199 = arith.extf %198 : vector<1x32xbf16> to vector<1x32xf32>
    %200 = vector.broadcast %199 : vector<1x32xf32> to vector<16x32xf32>
    %201 = arith.addf %197, %200 : vector<16x32xf32>
    %202 = arith.addf %201, %174 : vector<16x32xf32>
    %cst_66 = arith.constant dense<0.000000e+00> : vector<16xf32>
    %203 = vector.multi_reduction <add>, %202, %cst_66 [1] : vector<16x32xf32> to vector<16xf32>
    %204 = vector.shape_cast %203 : vector<16xf32> to vector<16x1xf32>
    %cst_67 = arith.constant 3.200000e+01 : f32
    %205 = vector.broadcast %cst_67 : f32 to vector<16x1xf32>
    %206 = arith.divf %204, %205 : vector<16x1xf32>
    %207 = vector.broadcast %206 : vector<16x1xf32> to vector<16x32xf32>
    %208 = arith.subf %202, %207 : vector<16x32xf32>
    %209 = vector.broadcast %206 : vector<16x1xf32> to vector<16x32xf32>
    %210 = arith.subf %202, %209 : vector<16x32xf32>
    %211 = arith.mulf %208, %210 : vector<16x32xf32>
    %cst_68 = arith.constant dense<0.000000e+00> : vector<16xf32>
    %212 = vector.multi_reduction <add>, %211, %cst_68 [1] : vector<16x32xf32> to vector<16xf32>
    %213 = vector.shape_cast %212 : vector<16xf32> to vector<16x1xf32>
    %cst_69 = arith.constant 3.200000e+01 : f32
    %214 = vector.broadcast %cst_69 : f32 to vector<16x1xf32>
    %215 = arith.divf %213, %214 : vector<16x1xf32>
    %216 = vector.broadcast %206 : vector<16x1xf32> to vector<16x32xf32>
    %217 = arith.subf %202, %216 : vector<16x32xf32>
    %cst_70 = arith.constant 9.99999996E-13 : f32
    %218 = vector.broadcast %cst_70 : f32 to vector<16x1xf32>
    %219 = arith.addf %215, %218 : vector<16x1xf32>
    %220 = math.rsqrt %219 : vector<16x1xf32>
    %221 = vector.broadcast %220 : vector<16x1xf32> to vector<16x32xf32>
    %222 = arith.mulf %217, %221 : vector<16x32xf32>
    %c368 = arith.constant 368 : index
    %c0_71 = arith.constant 0 : index
    %223 = vector.load %arg2[%c368, %c0_71] : memref<688x128xbf16, #tpu.memory_space<vmem>>, vector<1x32xbf16>
    %224 = arith.extf %223 : vector<1x32xbf16> to vector<1x32xf32>
    %225 = vector.broadcast %224 : vector<1x32xf32> to vector<16x32xf32>
    %226 = arith.mulf %222, %225 : vector<16x32xf32>
    %c376 = arith.constant 376 : index
    %c0_72 = arith.constant 0 : index
    %227 = vector.load %arg2[%c376, %c0_72] : memref<688x128xbf16, #tpu.memory_space<vmem>>, vector<1x32xbf16>
    %228 = arith.extf %227 : vector<1x32xbf16> to vector<1x32xf32>
    %229 = vector.broadcast %228 : vector<1x32xf32> to vector<16x32xf32>
    %230 = arith.addf %226, %229 : vector<16x32xf32>
    %231 = arith.truncf %230 : vector<16x32xf32> to vector<16x32xbf16>
    %c384 = arith.constant 384 : index
    %c0_73 = arith.constant 0 : index
    %232 = vector.load %arg2[%c384, %c0_73] : memref<688x128xbf16, #tpu.memory_space<vmem>>, vector<32x96xbf16>
    %cst_74 = arith.constant dense<0.000000e+00> : vector<16x96xf32>
    %233 = tpu.matmul %231, %232, %cst_74 {dimension_numbers = #tpu.dot_dimension_numbers<[1], [0], [0], [1], [0, 0, 1, 1], [], []>} : vector<16x32xbf16>, vector<32x96xbf16>, vector<16x96xf32> -> vector<16x96xf32>
    %c416 = arith.constant 416 : index
    %c0_75 = arith.constant 0 : index
    %234 = vector.load %arg2[%c416, %c0_75] : memref<688x128xbf16, #tpu.memory_space<vmem>>, vector<1x96xbf16>
    %235 = arith.extf %234 : vector<1x96xbf16> to vector<1x96xf32>
    %236 = vector.broadcast %235 : vector<1x96xf32> to vector<16x96xf32>
    %237 = arith.addf %233, %236 : vector<16x96xf32>
    %238 = vector.extract_strided_slice %237 {offsets = [0, 0], sizes = [16, 32], strides = [1, 1]} : vector<16x96xf32> to vector<16x32xf32>
    %239 = vector.extract_strided_slice %237 {offsets = [0, 32], sizes = [16, 32], strides = [1, 1]} : vector<16x96xf32> to vector<16x32xf32>
    %240 = vector.extract_strided_slice %237 {offsets = [0, 64], sizes = [16, 32], strides = [1, 1]} : vector<16x96xf32> to vector<16x32xf32>
    %241 = vector.extract_strided_slice %41 {offsets = [0, 0], sizes = [1, 8], strides = [1, 1]} : vector<2x8xf32> to vector<1x8xf32>
    %242 = vector.extract_strided_slice %238 {offsets = [0, 0], sizes = [8, 16], strides = [1, 1]} : vector<16x32xf32> to vector<8x16xf32>
    %243 = vector.extract_strided_slice %239 {offsets = [0, 0], sizes = [8, 16], strides = [1, 1]} : vector<16x32xf32> to vector<8x16xf32>
    %244 = vector.extract_strided_slice %240 {offsets = [0, 0], sizes = [8, 16], strides = [1, 1]} : vector<16x32xf32> to vector<8x16xf32>
    %245 = tpu.transpose %243, [1, 0] : vector<8x16xf32> -> vector<16x8xf32>
    %cst_76 = arith.constant dense<0.000000e+00> : vector<8x8xf32>
    %246 = tpu.matmul %242, %245, %cst_76 {dimension_numbers = #tpu.dot_dimension_numbers<[1], [0], [0], [1], [0, 0, 1, 1], [], []>} : vector<8x16xf32>, vector<16x8xf32>, vector<8x8xf32> -> vector<8x8xf32>
    %cst_77 = arith.constant 2.500000e-01 : f32
    %247 = vector.broadcast %cst_77 : f32 to vector<8x8xf32>
    %248 = arith.mulf %246, %247 : vector<8x8xf32>
    %249 = vector.broadcast %241 : vector<1x8xf32> to vector<8x8xf32>
    %250 = arith.addf %248, %249 : vector<8x8xf32>
    %cst_78 = arith.constant dense<0xFF800000> : vector<8xf32>
    %251 = vector.multi_reduction <maximumf>, %250, %cst_78 [1] : vector<8x8xf32> to vector<8xf32>
    %252 = vector.shape_cast %251 : vector<8xf32> to vector<8x1xf32>
    %253 = vector.broadcast %252 : vector<8x1xf32> to vector<8x8xf32>
    %254 = arith.subf %250, %253 : vector<8x8xf32>
    %255 = math.exp %254 : vector<8x8xf32>
    %cst_79 = arith.constant dense<0.000000e+00> : vector<8xf32>
    %256 = vector.multi_reduction <add>, %255, %cst_79 [1] : vector<8x8xf32> to vector<8xf32>
    %257 = vector.shape_cast %256 : vector<8xf32> to vector<8x1xf32>
    %258 = tpu.reciprocal %257 {approx = true} : vector<8x1xf32> -> vector<8x1xf32>
    %259 = vector.broadcast %258 : vector<8x1xf32> to vector<8x8xf32>
    %260 = arith.mulf %255, %259 : vector<8x8xf32>
    %cst_80 = arith.constant dense<0.000000e+00> : vector<8x16xf32>
    %261 = tpu.matmul %260, %244, %cst_80 {dimension_numbers = #tpu.dot_dimension_numbers<[1], [0], [0], [1], [0, 0, 1, 1], [], []>} : vector<8x8xf32>, vector<8x16xf32>, vector<8x16xf32> -> vector<8x16xf32>
    %c0_81 = arith.constant 0 : index
    %c0_82 = arith.constant 0 : index
    %262 = vector.load %arg4[%c0_81, %c0_82] : memref<16x32xf32, #tpu.memory_space<vmem>>, vector<8x16xf32>
    tpu.vector_store %arg4[%c0_81, %c0_82], %261 {strides = array<i32>} : memref<16x32xf32, #tpu.memory_space<vmem>>, vector<8x16xf32>,
    %263 = vector.extract_strided_slice %238 {offsets = [0, 16], sizes = [8, 16], strides = [1, 1]} : vector<16x32xf32> to vector<8x16xf32>
    %264 = vector.extract_strided_slice %239 {offsets = [0, 16], sizes = [8, 16], strides = [1, 1]} : vector<16x32xf32> to vector<8x16xf32>
    %265 = vector.extract_strided_slice %240 {offsets = [0, 16], sizes = [8, 16], strides = [1, 1]} : vector<16x32xf32> to vector<8x16xf32>
    %266 = tpu.transpose %264, [1, 0] : vector<8x16xf32> -> vector<16x8xf32>
    %cst_83 = arith.constant dense<0.000000e+00> : vector<8x8xf32>
    %267 = tpu.matmul %263, %266, %cst_83 {dimension_numbers = #tpu.dot_dimension_numbers<[1], [0], [0], [1], [0, 0, 1, 1], [], []>} : vector<8x16xf32>, vector<16x8xf32>, vector<8x8xf32> -> vector<8x8xf32>
    %cst_84 = arith.constant 2.500000e-01 : f32
    %268 = vector.broadcast %cst_84 : f32 to vector<8x8xf32>
    %269 = arith.mulf %267, %268 : vector<8x8xf32>
    %270 = vector.broadcast %241 : vector<1x8xf32> to vector<8x8xf32>
    %271 = arith.addf %269, %270 : vector<8x8xf32>
    %cst_85 = arith.constant dense<0xFF800000> : vector<8xf32>
    %272 = vector.multi_reduction <maximumf>, %271, %cst_85 [1] : vector<8x8xf32> to vector<8xf32>
    %273 = vector.shape_cast %272 : vector<8xf32> to vector<8x1xf32>
    %274 = vector.broadcast %273 : vector<8x1xf32> to vector<8x8xf32>
    %275 = arith.subf %271, %274 : vector<8x8xf32>
    %276 = math.exp %275 : vector<8x8xf32>
    %cst_86 = arith.constant dense<0.000000e+00> : vector<8xf32>
    %277 = vector.multi_reduction <add>, %276, %cst_86 [1] : vector<8x8xf32> to vector<8xf32>
    %278 = vector.shape_cast %277 : vector<8xf32> to vector<8x1xf32>
    %279 = tpu.reciprocal %278 {approx = true} : vector<8x1xf32> -> vector<8x1xf32>
    %280 = vector.broadcast %279 : vector<8x1xf32> to vector<8x8xf32>
    %281 = arith.mulf %276, %280 : vector<8x8xf32>
    %cst_87 = arith.constant dense<0.000000e+00> : vector<8x16xf32>
    %282 = tpu.matmul %281, %265, %cst_87 {dimension_numbers = #tpu.dot_dimension_numbers<[1], [0], [0], [1], [0, 0, 1, 1], [], []>} : vector<8x8xf32>, vector<8x16xf32>, vector<8x16xf32> -> vector<8x16xf32>
    %c0_88 = arith.constant 0 : index
    %c16_89 = arith.constant 16 : index
    %283 = vector.load %arg4[%c0_88, %c16_89] : memref<16x32xf32, #tpu.memory_space<vmem>>, vector<8x16xf32>
    tpu.vector_store %arg4[%c0_88, %c16_89], %282 {strides = array<i32>} : memref<16x32xf32, #tpu.memory_space<vmem>>, vector<8x16xf32>,
    %284 = vector.extract_strided_slice %41 {offsets = [1, 0], sizes = [1, 8], strides = [1, 1]} : vector<2x8xf32> to vector<1x8xf32>
    %285 = vector.extract_strided_slice %238 {offsets = [8, 0], sizes = [8, 16], strides = [1, 1]} : vector<16x32xf32> to vector<8x16xf32>
    %286 = vector.extract_strided_slice %239 {offsets = [8, 0], sizes = [8, 16], strides = [1, 1]} : vector<16x32xf32> to vector<8x16xf32>
    %287 = vector.extract_strided_slice %240 {offsets = [8, 0], sizes = [8, 16], strides = [1, 1]} : vector<16x32xf32> to vector<8x16xf32>
    %288 = tpu.transpose %286, [1, 0] : vector<8x16xf32> -> vector<16x8xf32>
    %cst_90 = arith.constant dense<0.000000e+00> : vector<8x8xf32>
    %289 = tpu.matmul %285, %288, %cst_90 {dimension_numbers = #tpu.dot_dimension_numbers<[1], [0], [0], [1], [0, 0, 1, 1], [], []>} : vector<8x16xf32>, vector<16x8xf32>, vector<8x8xf32> -> vector<8x8xf32>
    %cst_91 = arith.constant 2.500000e-01 : f32
    %290 = vector.broadcast %cst_91 : f32 to vector<8x8xf32>
    %291 = arith.mulf %289, %290 : vector<8x8xf32>
    %292 = vector.broadcast %284 : vector<1x8xf32> to vector<8x8xf32>
    %293 = arith.addf %291, %292 : vector<8x8xf32>
    %cst_92 = arith.constant dense<0xFF800000> : vector<8xf32>
    %294 = vector.multi_reduction <maximumf>, %293, %cst_92 [1] : vector<8x8xf32> to vector<8xf32>
    %295 = vector.shape_cast %294 : vector<8xf32> to vector<8x1xf32>
    %296 = vector.broadcast %295 : vector<8x1xf32> to vector<8x8xf32>
    %297 = arith.subf %293, %296 : vector<8x8xf32>
    %298 = math.exp %297 : vector<8x8xf32>
    %cst_93 = arith.constant dense<0.000000e+00> : vector<8xf32>
    %299 = vector.multi_reduction <add>, %298, %cst_93 [1] : vector<8x8xf32> to vector<8xf32>
    %300 = vector.shape_cast %299 : vector<8xf32> to vector<8x1xf32>
    %301 = tpu.reciprocal %300 {approx = true} : vector<8x1xf32> -> vector<8x1xf32>
    %302 = vector.broadcast %301 : vector<8x1xf32> to vector<8x8xf32>
    %303 = arith.mulf %298, %302 : vector<8x8xf32>
    %cst_94 = arith.constant dense<0.000000e+00> : vector<8x16xf32>
    %304 = tpu.matmul %303, %287, %cst_94 {dimension_numbers = #tpu.dot_dimension_numbers<[1], [0], [0], [1], [0, 0, 1, 1], [], []>} : vector<8x8xf32>, vector<8x16xf32>, vector<8x16xf32> -> vector<8x16xf32>
    %c8_95 = arith.constant 8 : index
    %c0_96 = arith.constant 0 : index
    %305 = vector.load %arg4[%c8_95, %c0_96] : memref<16x32xf32, #tpu.memory_space<vmem>>, vector<8x16xf32>
    tpu.vector_store %arg4[%c8_95, %c0_96], %304 {strides = array<i32>} : memref<16x32xf32, #tpu.memory_space<vmem>>, vector<8x16xf32>,
    %306 = vector.extract_strided_slice %238 {offsets = [8, 16], sizes = [8, 16], strides = [1, 1]} : vector<16x32xf32> to vector<8x16xf32>
    %307 = vector.extract_strided_slice %239 {offsets = [8, 16], sizes = [8, 16], strides = [1, 1]} : vector<16x32xf32> to vector<8x16xf32>
    %308 = vector.extract_strided_slice %240 {offsets = [8, 16], sizes = [8, 16], strides = [1, 1]} : vector<16x32xf32> to vector<8x16xf32>
    %309 = tpu.transpose %307, [1, 0] : vector<8x16xf32> -> vector<16x8xf32>
    %cst_97 = arith.constant dense<0.000000e+00> : vector<8x8xf32>
    %310 = tpu.matmul %306, %309, %cst_97 {dimension_numbers = #tpu.dot_dimension_numbers<[1], [0], [0], [1], [0, 0, 1, 1], [], []>} : vector<8x16xf32>, vector<16x8xf32>, vector<8x8xf32> -> vector<8x8xf32>
    %cst_98 = arith.constant 2.500000e-01 : f32
    %311 = vector.broadcast %cst_98 : f32 to vector<8x8xf32>
    %312 = arith.mulf %310, %311 : vector<8x8xf32>
    %313 = vector.broadcast %284 : vector<1x8xf32> to vector<8x8xf32>
    %314 = arith.addf %312, %313 : vector<8x8xf32>
    %cst_99 = arith.constant dense<0xFF800000> : vector<8xf32>
    %315 = vector.multi_reduction <maximumf>, %314, %cst_99 [1] : vector<8x8xf32> to vector<8xf32>
    %316 = vector.shape_cast %315 : vector<8xf32> to vector<8x1xf32>
    %317 = vector.broadcast %316 : vector<8x1xf32> to vector<8x8xf32>
    %318 = arith.subf %314, %317 : vector<8x8xf32>
    %319 = math.exp %318 : vector<8x8xf32>
    %cst_100 = arith.constant dense<0.000000e+00> : vector<8xf32>
    %320 = vector.multi_reduction <add>, %319, %cst_100 [1] : vector<8x8xf32> to vector<8xf32>
    %321 = vector.shape_cast %320 : vector<8xf32> to vector<8x1xf32>
    %322 = tpu.reciprocal %321 {approx = true} : vector<8x1xf32> -> vector<8x1xf32>
    %323 = vector.broadcast %322 : vector<8x1xf32> to vector<8x8xf32>
    %324 = arith.mulf %319, %323 : vector<8x8xf32>
    %cst_101 = arith.constant dense<0.000000e+00> : vector<8x16xf32>
    %325 = tpu.matmul %324, %308, %cst_101 {dimension_numbers = #tpu.dot_dimension_numbers<[1], [0], [0], [1], [0, 0, 1, 1], [], []>} : vector<8x8xf32>, vector<8x16xf32>, vector<8x16xf32> -> vector<8x16xf32>
    %c8_102 = arith.constant 8 : index
    %c16_103 = arith.constant 16 : index
    %326 = vector.load %arg4[%c8_102, %c16_103] : memref<16x32xf32, #tpu.memory_space<vmem>>, vector<8x16xf32>
    tpu.vector_store %arg4[%c8_102, %c16_103], %325 {strides = array<i32>} : memref<16x32xf32, #tpu.memory_space<vmem>>, vector<8x16xf32>,
    %c0_104 = arith.constant 0 : index
    %c0_105 = arith.constant 0 : index
    %327 = vector.load %arg4[%c0_104, %c0_105] : memref<16x32xf32, #tpu.memory_space<vmem>>, vector<16x32xf32>
    %328 = arith.truncf %327 : vector<16x32xf32> to vector<16x32xbf16>
    %c424 = arith.constant 424 : index
    %c0_106 = arith.constant 0 : index
    %329 = vector.load %arg2[%c424, %c0_106] : memref<688x128xbf16, #tpu.memory_space<vmem>>, vector<32x32xbf16>
    %cst_107 = arith.constant dense<0.000000e+00> : vector<16x32xf32>
    %330 = tpu.matmul %328, %329, %cst_107 {dimension_numbers = #tpu.dot_dimension_numbers<[1], [0], [0], [1], [0, 0, 1, 1], [], []>} : vector<16x32xbf16>, vector<32x32xbf16>, vector<16x32xf32> -> vector<16x32xf32>
    %c456 = arith.constant 456 : index
    %c0_108 = arith.constant 0 : index
    %331 = vector.load %arg2[%c456, %c0_108] : memref<688x128xbf16, #tpu.memory_space<vmem>>, vector<1x32xbf16>
    %332 = arith.extf %331 : vector<1x32xbf16> to vector<1x32xf32>
    %333 = vector.broadcast %332 : vector<1x32xf32> to vector<16x32xf32>
    %334 = arith.addf %330, %333 : vector<16x32xf32>
    %335 = arith.addf %334, %230 : vector<16x32xf32>
    %cst_109 = arith.constant dense<0.000000e+00> : vector<16xf32>
    %336 = vector.multi_reduction <add>, %335, %cst_109 [1] : vector<16x32xf32> to vector<16xf32>
    %337 = vector.shape_cast %336 : vector<16xf32> to vector<16x1xf32>
    %cst_110 = arith.constant 3.200000e+01 : f32
    %338 = vector.broadcast %cst_110 : f32 to vector<16x1xf32>
    %339 = arith.divf %337, %338 : vector<16x1xf32>
    %340 = vector.broadcast %339 : vector<16x1xf32> to vector<16x32xf32>
    %341 = arith.subf %335, %340 : vector<16x32xf32>
    %342 = vector.broadcast %339 : vector<16x1xf32> to vector<16x32xf32>
    %343 = arith.subf %335, %342 : vector<16x32xf32>
    %344 = arith.mulf %341, %343 : vector<16x32xf32>
    %cst_111 = arith.constant dense<0.000000e+00> : vector<16xf32>
    %345 = vector.multi_reduction <add>, %344, %cst_111 [1] : vector<16x32xf32> to vector<16xf32>
    %346 = vector.shape_cast %345 : vector<16xf32> to vector<16x1xf32>
    %cst_112 = arith.constant 3.200000e+01 : f32
    %347 = vector.broadcast %cst_112 : f32 to vector<16x1xf32>
    %348 = arith.divf %346, %347 : vector<16x1xf32>
    %349 = vector.broadcast %339 : vector<16x1xf32> to vector<16x32xf32>
    %350 = arith.subf %335, %349 : vector<16x32xf32>
    %cst_113 = arith.constant 9.99999996E-13 : f32
    %351 = vector.broadcast %cst_113 : f32 to vector<16x1xf32>
    %352 = arith.addf %348, %351 : vector<16x1xf32>
    %353 = math.rsqrt %352 : vector<16x1xf32>
    %354 = vector.broadcast %353 : vector<16x1xf32> to vector<16x32xf32>
    %355 = arith.mulf %350, %354 : vector<16x32xf32>
    %c464 = arith.constant 464 : index
    %c0_114 = arith.constant 0 : index
    %356 = vector.load %arg2[%c464, %c0_114] : memref<688x128xbf16, #tpu.memory_space<vmem>>, vector<1x32xbf16>
    %357 = arith.extf %356 : vector<1x32xbf16> to vector<1x32xf32>
    %358 = vector.broadcast %357 : vector<1x32xf32> to vector<16x32xf32>
    %359 = arith.mulf %355, %358 : vector<16x32xf32>
    %c472 = arith.constant 472 : index
    %c0_115 = arith.constant 0 : index
    %360 = vector.load %arg2[%c472, %c0_115] : memref<688x128xbf16, #tpu.memory_space<vmem>>, vector<1x32xbf16>
    %361 = arith.extf %360 : vector<1x32xbf16> to vector<1x32xf32>
    %362 = vector.broadcast %361 : vector<1x32xf32> to vector<16x32xf32>
    %363 = arith.addf %359, %362 : vector<16x32xf32>
    %364 = arith.truncf %363 : vector<16x32xf32> to vector<16x32xbf16>
    %c480 = arith.constant 480 : index
    %c0_116 = arith.constant 0 : index
    %365 = vector.load %arg2[%c480, %c0_116] : memref<688x128xbf16, #tpu.memory_space<vmem>>, vector<32x64xbf16>
    %cst_117 = arith.constant dense<0.000000e+00> : vector<16x64xf32>
    %366 = tpu.matmul %364, %365, %cst_117 {dimension_numbers = #tpu.dot_dimension_numbers<[1], [0], [0], [1], [0, 0, 1, 1], [], []>} : vector<16x32xbf16>, vector<32x64xbf16>, vector<16x64xf32> -> vector<16x64xf32>
    %c512 = arith.constant 512 : index
    %c0_118 = arith.constant 0 : index
    %367 = vector.load %arg2[%c512, %c0_118] : memref<688x128xbf16, #tpu.memory_space<vmem>>, vector<1x64xbf16>
    %368 = arith.extf %367 : vector<1x64xbf16> to vector<1x64xf32>
    %369 = vector.broadcast %368 : vector<1x64xf32> to vector<16x64xf32>
    %370 = arith.addf %366, %369 : vector<16x64xf32>
    %cst_119 = arith.constant 5.000000e-01 : f32
    %371 = vector.broadcast %cst_119 : f32 to vector<16x64xf32>
    %372 = arith.mulf %371, %370 : vector<16x64xf32>
    %cst_120 = arith.constant 4.471500e-02 : f32
    %373 = vector.broadcast %cst_120 : f32 to vector<16x64xf32>
    %374 = arith.mulf %373, %370 : vector<16x64xf32>
    %375 = arith.mulf %374, %370 : vector<16x64xf32>
    %376 = arith.mulf %375, %370 : vector<16x64xf32>
    %377 = arith.addf %370, %376 : vector<16x64xf32>
    %cst_121 = arith.constant 0.797884583 : f32
    %378 = vector.broadcast %cst_121 : f32 to vector<16x64xf32>
    %379 = arith.mulf %378, %377 : vector<16x64xf32>
    %380 = math.tanh %379 : vector<16x64xf32>
    %cst_122 = arith.constant 1.000000e+00 : f32
    %381 = vector.broadcast %cst_122 : f32 to vector<16x64xf32>
    %382 = arith.addf %381, %380 : vector<16x64xf32>
    %383 = arith.mulf %372, %382 : vector<16x64xf32>
    %384 = arith.truncf %383 : vector<16x64xf32> to vector<16x64xbf16>
    %c520 = arith.constant 520 : index
    %c0_123 = arith.constant 0 : index
    %385 = vector.load %arg2[%c520, %c0_123] : memref<688x128xbf16, #tpu.memory_space<vmem>>, vector<64x32xbf16>
    %cst_124 = arith.constant dense<0.000000e+00> : vector<16x32xf32>
    %386 = tpu.matmul %384, %385, %cst_124 {dimension_numbers = #tpu.dot_dimension_numbers<[1], [0], [0], [1], [0, 0, 1, 1], [], []>} : vector<16x64xbf16>, vector<64x32xbf16>, vector<16x32xf32> -> vector<16x32xf32>
    %c584 = arith.constant 584 : index
    %c0_125 = arith.constant 0 : index
    %387 = vector.load %arg2[%c584, %c0_125] : memref<688x128xbf16, #tpu.memory_space<vmem>>, vector<1x32xbf16>
    %388 = arith.extf %387 : vector<1x32xbf16> to vector<1x32xf32>
    %389 = vector.broadcast %388 : vector<1x32xf32> to vector<16x32xf32>
    %390 = arith.addf %386, %389 : vector<16x32xf32>
    %391 = arith.addf %390, %363 : vector<16x32xf32>
    %cst_126 = arith.constant dense<0.000000e+00> : vector<16xf32>
    %392 = vector.multi_reduction <add>, %391, %cst_126 [1] : vector<16x32xf32> to vector<16xf32>
    %393 = vector.shape_cast %392 : vector<16xf32> to vector<16x1xf32>
    %cst_127 = arith.constant 3.200000e+01 : f32
    %394 = vector.broadcast %cst_127 : f32 to vector<16x1xf32>
    %395 = arith.divf %393, %394 : vector<16x1xf32>
    %396 = vector.broadcast %395 : vector<16x1xf32> to vector<16x32xf32>
    %397 = arith.subf %391, %396 : vector<16x32xf32>
    %398 = vector.broadcast %395 : vector<16x1xf32> to vector<16x32xf32>
    %399 = arith.subf %391, %398 : vector<16x32xf32>
    %400 = arith.mulf %397, %399 : vector<16x32xf32>
    %cst_128 = arith.constant dense<0.000000e+00> : vector<16xf32>
    %401 = vector.multi_reduction <add>, %400, %cst_128 [1] : vector<16x32xf32> to vector<16xf32>
    %402 = vector.shape_cast %401 : vector<16xf32> to vector<16x1xf32>
    %cst_129 = arith.constant 3.200000e+01 : f32
    %403 = vector.broadcast %cst_129 : f32 to vector<16x1xf32>
    %404 = arith.divf %402, %403 : vector<16x1xf32>
    %405 = vector.broadcast %395 : vector<16x1xf32> to vector<16x32xf32>
    %406 = arith.subf %391, %405 : vector<16x32xf32>
    %cst_130 = arith.constant 9.99999996E-13 : f32
    %407 = vector.broadcast %cst_130 : f32 to vector<16x1xf32>
    %408 = arith.addf %404, %407 : vector<16x1xf32>
    %409 = math.rsqrt %408 : vector<16x1xf32>
    %410 = vector.broadcast %409 : vector<16x1xf32> to vector<16x32xf32>
    %411 = arith.mulf %406, %410 : vector<16x32xf32>
    %c592 = arith.constant 592 : index
    %c0_131 = arith.constant 0 : index
    %412 = vector.load %arg2[%c592, %c0_131] : memref<688x128xbf16, #tpu.memory_space<vmem>>, vector<1x32xbf16>
    %413 = arith.extf %412 : vector<1x32xbf16> to vector<1x32xf32>
    %414 = vector.broadcast %413 : vector<1x32xf32> to vector<16x32xf32>
    %415 = arith.mulf %411, %414 : vector<16x32xf32>
    %c600 = arith.constant 600 : index
    %c0_132 = arith.constant 0 : index
    %416 = vector.load %arg2[%c600, %c0_132] : memref<688x128xbf16, #tpu.memory_space<vmem>>, vector<1x32xbf16>
    %417 = arith.extf %416 : vector<1x32xbf16> to vector<1x32xf32>
    %418 = vector.broadcast %417 : vector<1x32xf32> to vector<16x32xf32>
    %419 = arith.addf %415, %418 : vector<16x32xf32>
    %420 = arith.truncf %419 : vector<16x32xf32> to vector<16x32xbf16>
    %c608 = arith.constant 608 : index
    %c0_133 = arith.constant 0 : index
    %421 = vector.load %arg2[%c608, %c0_133] : memref<688x128xbf16, #tpu.memory_space<vmem>>, vector<32x32xbf16>
    %cst_134 = arith.constant dense<0.000000e+00> : vector<16x32xf32>
    %422 = tpu.matmul %420, %421, %cst_134 {dimension_numbers = #tpu.dot_dimension_numbers<[1], [0], [0], [1], [0, 0, 1, 1], [], []>} : vector<16x32xbf16>, vector<32x32xbf16>, vector<16x32xf32> -> vector<16x32xf32>
    %c640 = arith.constant 640 : index
    %c0_135 = arith.constant 0 : index
    %423 = vector.load %arg2[%c640, %c0_135] : memref<688x128xbf16, #tpu.memory_space<vmem>>, vector<1x32xbf16>
    %424 = arith.extf %423 : vector<1x32xbf16> to vector<1x32xf32>
    %425 = vector.broadcast %424 : vector<1x32xf32> to vector<16x32xf32>
    %426 = arith.addf %422, %425 : vector<16x32xf32>
    %427 = math.tanh %426 : vector<16x32xf32>
    %428 = arith.truncf %427 : vector<16x32xf32> to vector<16x32xbf16>
    %c648 = arith.constant 648 : index
    %c0_136 = arith.constant 0 : index
    %429 = vector.load %arg2[%c648, %c0_136] : memref<688x128xbf16, #tpu.memory_space<vmem>>, vector<32x3xbf16>
    %cst_137 = arith.constant dense<0.000000e+00> : vector<16x3xf32>
    %430 = tpu.matmul %428, %429, %cst_137 {dimension_numbers = #tpu.dot_dimension_numbers<[1], [0], [0], [1], [0, 0, 1, 1], [], []>} : vector<16x32xbf16>, vector<32x3xbf16>, vector<16x3xf32> -> vector<16x3xf32>
    %c680 = arith.constant 680 : index
    %c0_138 = arith.constant 0 : index
    %431 = vector.load %arg2[%c680, %c0_138] : memref<688x128xbf16, #tpu.memory_space<vmem>>, vector<1x3xbf16>
    %432 = arith.extf %431 : vector<1x3xbf16> to vector<1x3xf32>
    %433 = vector.broadcast %432 : vector<1x3xf32> to vector<16x3xf32>
    %434 = arith.addf %430, %433 : vector<16x3xf32>
    %435 = vector.extract_strided_slice %434 {offsets = [0, 0], sizes = [1, 3], strides = [1, 1]} : vector<16x3xf32> to vector<1x3xf32>
    %c0_139 = arith.constant 0 : index
    %c0_140 = arith.constant 0 : index
    %436 = vector.load %arg3[%c0_139, %c0_140] : memref<2x3xf32, #tpu.memory_space<vmem>>, vector<1x3xf32>
    tpu.vector_store %arg3[%c0_139, %c0_140], %435 {strides = array<i32>} : memref<2x3xf32, #tpu.memory_space<vmem>>, vector<1x3xf32>,
    %437 = vector.extract_strided_slice %434 {offsets = [8, 0], sizes = [1, 3], strides = [1, 1]} : vector<16x3xf32> to vector<1x3xf32>
    %c1 = arith.constant 1 : index
    %c0_141 = arith.constant 0 : index
    %438 = vector.load %arg3[%c1, %c0_141] : memref<2x3xf32, #tpu.memory_space<vmem>>, vector<1x3xf32>
    tpu.vector_store %arg3[%c1, %c0_141], %437 {strides = array<i32>} : memref<2x3xf32, #tpu.memory_space<vmem>>, vector<1x3xf32>,
    return
  }
}

</mosaic_0001>

<bundles_post_ra>
// kernel: tpu_custom_call.1
= control target key start
LH: loop header
LB: loop body
LE: loop exit
PB: predicated region body
PF: predicated region fallthrough
CT: control target
= control target key end

     0   :  { %8 = vsyncpa [#allocation4], 0  ;;  %s3354_s0 = inlined_call_operand.vmem [shape: s32[16,1], index: 0, kind: input, shape index: {}]   ;;  %s3355_s1 = inlined_call_operand.vmem [shape: f32[2,8], index: 1, kind: input, shape index: {}]   ;;  %s3356_s2 = inlined_call_operand.hbm [shape: bf16[688,128], index: 2, kind: input, shape index: {}]   ;;  %s3357_s3 = inlined_call_operand.hbm [shape: f32[2,3], index: 3, kind: output, shape index: {}]  }
   0x1   :  { %9 = vsyncpa [#allocation5], 0  ;;  %s2999_s12 = smov [#allocation3]   ;;  %s2951_s16 = scalar_lea.hbm %s3356_s2, 5504 }
   0x2   :  { %s19_s13 = sshll.u32 %s2999_s12, 4  ;;  %p2952_p0 = scmp.ne.s32.totalorder %s3356_s2, %s2951_s16  ;;  %s20_s13 = int_to_ptr.vmem [resolvable:$true] %s19_s13 }
   0x3   :  { %p2955_p1 = scmp.lt.u32.totalorder %s2951_s16, %s3356_s2 }
   0x5   :  { %p2957_p2 = pnand %p2955_p1, %p2952_p0 }
   0x7   :  { %2960 = shalt.err (!%p2957_p2)
}
   0x8   :  { %s2961_s21 = scalar_lea.vmem %s20_s13, 5504  ;;  %p2966_p4 = scmp.lt.s32.totalorder %s20_s13, %s20_s13 }
   0x9   :  { %p2962_p3 = scmp.ne.s32.totalorder %s20_s13, %s2961_s21  ;;  %p2967_p5 = scmp.lt.s32.totalorder %s2961_s21, %s2961_s21 }
   0xb   :  { %p2968_p6 = por %p2967_p5, %p2966_p4 }
   0xd   :  { %p2969_p7 = pnand %p2968_p6, %p2962_p3 }
   0xf   :  { %2972 = shalt.err (!%p2969_p7)
}
  0x10   :  { %s3000_s22 = smov 64   ;;  %s3001_s23 = smov 4  }
  0x11   :  { %25 = dma.hbm_to_vmem [thread:$0]  %s3356_s2, 5504, %s20_s13, [#allocation4], %s3000_s22, %s3000_s22, %s3001_s23  }
  0x12   :  { %2995 = dma.done.wait [#allocation4], 5504  }
  0x13   :  { %2996 = vsyncadd [#allocation4], 4294961792  ;;  %v3002_v0 = vmov 0   ;;  %v3003_v1 = vmov 0.0   ;;  %v30_v2 = vld [vmem:[%s3354_s0] sm:$0xff]  ;;  %v2855_v3 = vld [vmem:[#allocation3] sm:$0xff]   ;;  %v32_v12 = vlaneseq }
  0x14   :  { %2854 = vset.pattern.permute.xlu0 %v3002_v0  ;;  %2653 = vmatprep.subr.bf16.mxu0 %v3003_v1  ;;  %v31_v4 = vld [vmem:[%s3354_s0 + $0x8] sm:$0xff]  ;;  %v2856_v5 = vld [vmem:[#allocation3 + $0x8] sm:$0xff]   ;;  %vm3004_vm0 = vmmov 0   ;;  %v2857_v6 = vld [vmem:[#allocation3 + $0x10] sm:$0xff]   ;;  %v3005_v16 = vmov 1.0|1.0  }
  0x15   :  { %2673 = vmatprep.subr.bf16.mxu1 %v3003_v1  ;;  %35 = vperm.xlu0 %2854, %v30_v2   ;;  %v2858_v7 = vld [vmem:[#allocation3 + $0x18] sm:$0xff]   ;;  %v2859_v8 = vld [vmem:[#allocation3 + $0x20] sm:$0xff]   ;;  %v2860_v9 = vld [vmem:[#allocation3 + $0x28] sm:$0xff]   ;;  %v33_v14 = vand.u32 127, %v32_v12  ;;  %vm154_vm4 = vcmask 261120   ;;  %v3074_v46 = vshrl.u32 %v32_v12, 7 }
  0x16   :  { %2654 = vmatpush3.bf16.msra.mxu0 %v2855_v3  ;;  %2669 = vmatprep.mubr.msk.bf16.mxu0 %vm3004_vm0, %v3003_v1  ;;  %v2861_v10 = vld [vmem:[#allocation3 + $0x30] sm:$0xff]   ;;  %v2862_v11 = vld [vmem:[#allocation3 + $0x38] sm:$0xff]   ;;  %v2577_v17 = vld [vmem:[#allocation3 + $0x40] sm:$0xff]   ;;  %s3006_s0 = smov 96   ;;  %vm269_vm5 = vcmask 130048   ;;  %vm350_vm6 = vcmask 64512  }
  0x17   :  { %2655 = vmatprep.subr.bf16.mxu0 %v3003_v1  ;;  %2677 = vmatprep.mubr.msk.bf16.mxu1 %vm3004_vm0, %v3003_v1  ;;  %v2575_v18 = vunpack.c.l.bf16 %v2577_v17  ;;  %v2576_v19 = vunpack.c.h.bf16 %v2577_v17  ;;  %v2863_v38 = vld [vmem:[#allocation3 + $0x50] sm:$0xff]   ;;  %v2864_v39 = vld [vmem:[#allocation3 + $0x58] sm:$0xff]   ;;  %v182_v47 = vld [vmem:[#allocation3 + $0x48] sm:$0x1]  ;;  %v3077_v48 = vsub.s32 0, %v3074_v46  ;;  %s3007_s4 = smov 112  }
  0x18   :  { %2674 = vmatpush3.bf16.msra.mxu1 %v2863_v38  ;;  %v183_v49 = vunpack.c.l.bf16 %v182_v47  ;;  %v190_v50 = vld [vmem:[#allocation3 + $0x4c] sm:$0x1]  ;;  %v204_v63 = vld [vmem:[#allocation3 + $0x60] sm:$0x1]  ;;  %s3009_s5 = smov 48   ;;  %s3010_s6 = smov 16  }
  0x19   :  { %38 = vperm.xlu0 %2854, %v31_v4   ;;  %2675 = vmatprep.subr.bf16.mxu1 %v3003_v1  ;;  %v191_v54 = vunpack.c.l.bf16 %v190_v50  ;;  %v205_v0 = vunpack.c.l.bf16 %v204_v63  ;;  %vm610_vm7 = vcmask 261248   ;;  %vm1192_vm8 = vcmask 523264   ;;  %s3011_s7 = smov [#allocation6]  }
  0x1a   :  { %2656 = vmatpush3.bf16.msra.mxu0 %v2856_v5  ;;  %v187_v53 = vrot.slane %v183_v49, %v3077_v48  ;;  %v692_v49 = vsub.s32 1, %v3074_v46  ;;  %vm2487_vm9 = vcmask 16384   ;;  %s2496_s8 = sshll.u32 %s3011_s7, 4  ;;  %s2497_s8 = int_to_ptr.vmem [resolvable:$true] %s2496_s8 }
  0x1b   :  { %2657 = vmatprep.subr.bf16.mxu0 %v3003_v1  ;;  %v195_v58 = vrot.slane %v191_v54, %v3077_v48  ;;  %v209_v2 = vrot.slane %v205_v0, %v3077_v48  ;;  %s2973_s9 = scalar_lea.vmem %s2497_s8, 32  ;;  %p2978_p9 = scmp.lt.s32.totalorder %s2497_s8, %s2497_s8 }
  0x1c   :  { %2676 = vmatpush3.bf16.msra.mxu1 %v2864_v39  ;;  %p2974_p8 = scmp.ne.s32.totalorder %s2497_s8, %s2973_s9  ;;  %p2979_p10 = scmp.lt.s32.totalorder %s2973_s9, %s2973_s9 }
  0x1d   :  { %2681 = vmatprep.subr.mxu1 %v3003_v1 }
  0x1e   :  { %2658 = vmatpush3.bf16.msra.mxu0 %v2857_v6  ;;  %p2980_p11 = por %p2979_p10, %p2978_p9 }
  0x1f   :  { %2659 = vmatprep.subr.bf16.mxu0 %v3003_v1 }
  0x20   :  { %p2981_p12 = pnand %p2980_p11, %p2974_p8 }
  0x22   :  { %2660 = vmatpush3.bf16.msra.mxu0 %v2858_v7 }
  0x23   :  { %2661 = vmatprep.subr.bf16.mxu0 %v3003_v1 }
  0x26   :  { %2662 = vmatpush3.bf16.msra.mxu0 %v2859_v8 }
  0x27   :  { %2663 = vmatprep.subr.bf16.mxu0 %v3003_v1 }
  0x2a   :  { %2664 = vmatpush3.bf16.msra.mxu0 %v2860_v9 }
  0x2b   :  { %2665 = vmatprep.subr.bf16.mxu0 %v3003_v1 }
  0x2e   :  { %2666 = vmatpush3.bf16.msra.mxu0 %v2861_v10 }
  0x2f   :  { %2667 = vmatprep.subr.bf16.mxu0 %v3003_v1 }
  0x32   :  { %2668 = vmatpush3.bf16.msra.mxu0 %v2862_v11  ;;  %v3104_v11 = vld [vmem:[%s3355_s1] sm:$0x3]  ;;  %s3008_s1 = smov 80  }
  0x33   :  { %2711 = vmatprep.subr.mxu0 %v3003_v1  ;;  %v3108_v12 = vrot.slane %v3104_v11, %v3077_v48  ;;  %v3151_v50 = vrot.slane %v3104_v11, %v692_v49 }
  0x94   :  { %v36_v13 = vpop.permute.xlu0 %35 }
  0x95   :  { %vm40_vm1 = vcmp.eq.s32.totalorder %v33_v14, %v36_v13 }
  0x98   :  { %v39_v15 = vpop.permute.xlu0 %38 }
  0x99   :  { %vm41_vm2 = vcmp.eq.s32.totalorder %v33_v14, %v39_v15 }
  0x9a   :  { %vm2513_vm3 = vmpackc.low %vm41_vm2, %vm40_vm1 }
  0x9b   :  { %2670 = vmatmul.mubr.msk.bf16.vlgmr.msra.gmra.mrb[0].mxu0 %vm2513_vm3, %v3005_v16 }
  0x9c   :  { %2713 = vmatprep.mubr.msk.f32.mxu0 %vm3004_vm0, %v3003_v1 }
 0x16e   :  { %v147_v20 = vpop.f32.mrb[0].mxu0 }
 0x16f   :  { %v148_v21 = vadd.f32 %v2575_v18, %v147_v20  ;;  %v2671_v22 = vpop.f32.mrb[1].mxu0 }
 0x170   :  { %v150_v23 = vpop.f32.mrb[2].mxu0 }
 0x171   :  { %v151_v24 = vadd.f32 %v2576_v19, %v150_v23  ;;  %v2672_v25 = vpop.f32.mrb[3].mxu0  ;;  %v155_v26 = vsel %vm154_vm4, %v148_v21, 0.0 }
 0x172   :  { %156 = vadd.xlane.f32.xlu1 %v155_v26 }
 0x173   :  { %v158_v27 = vsel %vm154_vm4, %v151_v24, 0.0 }
 0x176   :  { %159 = vadd.xlane.f32.xlu1 %v158_v27 }
 0x1ff   :  { %v157_v28 = vpop.xlane.xlu1 %156 }
 0x200   :  { %v162_v29 = vmul.f32 0.03125, %v157_v28 }
 0x202   :  { %v164_v30 = vsub.f32 %v148_v21, %v162_v29 }
 0x203   :  { %v160_v31 = vpop.xlane.xlu1 %159 }
 0x204   :  { %v163_v32 = vmul.f32 0.03125, %v160_v31  ;;  %v166_v33 = vmul.f32 %v164_v30, %v164_v30 }
 0x206   :  { %v165_v34 = vsub.f32 %v151_v24, %v163_v32  ;;  %v168_v35 = vsel %vm154_vm4, %v166_v33, 0.0 }
 0x207   :  { %169 = vadd.xlane.f32.xlu0 %v168_v35 }
 0x208   :  { %v167_v36 = vmul.f32 %v165_v34, %v165_v34 }
 0x20a   :  { %v171_v37 = vsel %vm154_vm4, %v167_v36, 0.0 }
 0x20b   :  { %172 = vadd.xlane.f32.xlu1 %v171_v37 }
 0x294   :  { %v170_v40 = vpop.xlane.xlu0 %169 }
 0x295   :  { %v174_v41 = vmul.f32 0.03125, %v170_v40 }
 0x297   :  { %v176_v42 = vadd.f32 1e-12, %v174_v41 }
 0x298   :  { %v173_v43 = vpop.xlane.xlu1 %172 }
 0x299   :  { %2887 = vrsqrt.f32 %v176_v42  ;;  %v175_v44 = vmul.f32 0.03125, %v173_v43 }
 0x29b   :  { %v177_v45 = vadd.f32 1e-12, %v175_v44 }
 0x29d   :  { %2889 = vrsqrt.f32 %v177_v45 }
 0x2a3   :  { %v2888_v51 = vpop.eup %2887 }
 0x2a4   :  { %v180_v52 = vmul.f32 %v2888_v51, %v164_v30 }
 0x2a6   :  { %v188_v57 = vmul.f32 %v187_v53, %v180_v52 }
 0x2a7   :  { %v2890_v55 = vpop.eup %2889 }
 0x2a8   :  { %v181_v56 = vmul.f32 %v2890_v55, %v165_v34  ;;  %v3081_v60 = vadd.f32 %v195_v58, %v188_v57 }
 0x2aa   :  { %v189_v59 = vmul.f32 %v187_v53, %v181_v56 }
 0x2ac   :  { %v3083_v61 = vadd.f32 %v195_v58, %v189_v59 }
 0x2ae   :  { %v199_v62 = vpack.c.bf16 %v3083_v61, %v3081_v60 }
 0x2b0   :  { %2678 = vmatmul.mubr.msk.bf16.vlgmr.msra.gmra.mrb[0].mxu1 %vm154_vm4, %v199_v62 }
 0x2b1   :  { %2683 = vmatprep.mubr.msk.f32.mxu1 %vm3004_vm0, %v3003_v1 }
 0x383   :  { %v259_v3 = vpop.f32.mrb[0].mxu1 }
 0x384   :  { %v260_v4 = vadd.f32 %v259_v3, %v209_v2  ;;  %v2679_v5 = vpop.f32.mrb[1].mxu1 }
 0x385   :  { %v262_v6 = vpop.f32.mrb[2].mxu1 }
 0x386   :  { %v3091_v7 = vadd.f32 %v262_v6, %v209_v2  ;;  %362 = vrot.lane.b32.xlu0 %v260_v4, %s3000_s22  ;;  %267 = vrot.lane.b32.xlu1 %v260_v4, %s3006_s0  ;;  %v2680_v8 = vpop.f32.mrb[3].mxu1 }
 0x3f8   :  { %v268_v9 = vpop.permute.xlu1 %267  ;;  %v363_v10 = vpop.permute.xlu0 %362 }
 0x3f9   :  { %2682 = vmatpush3.xpose.msk.msra.mxu1 %vm269_vm5, %v268_v9 }
 0x3fa   :  { %2686 = vmatprep.subr.mxu1 %v3003_v1 }
 0x3fc   :  { %2684 = vmatmul.mubr.msk.f32.vlgmr.msra.gmra.mrb[4].mxu1 %vm269_vm5, %v260_v4 }
 0x3fd   :  { %2687 = vmatpush3.msra.mxu1 %v363_v10  ;;  %2688 = vmatprep.mubr.msk.f32.mxu1 %vm3004_vm0, %v3003_v1 }
 0x3fe   :  { %2691 = vmatprep.subr.mxu1 %v3003_v1 }
 0x4cf   :  { %v340_v13 = vpop.f32.mrb[4].mxu1 }
 0x4d0   :  { %v344_v14 = vmul.f32 0.25, %v340_v13  ;;  %v2685_v15 = vpop.f32.mrb[5].mxu1 }
 0x4d2   :  { %v349_v16 = vadd.f32 %v3108_v12, %v344_v14 }
 0x4d4   :  { %v351_v17 = vsel %vm350_vm6, %v349_v16, -inf }
 0x4d5   :  { %352 = vmax.xlane.f32.xlu1 %v351_v17 }
 0x4e6   :  { %439 = vrot.lane.b32.xlu1 %v260_v4, %s3007_s4 }
 0x562   :  { %v353_v18 = vpop.xlane.xlu1 %352 }
 0x563   :  { %v354_v19 = vsub.f32 %v349_v16, %v353_v18 }
 0x565   :  { %v355_v20 = vmul.f32 1.442695, %v354_v19 }
 0x566   :  { %v440_v27 = vpop.permute.xlu1 %439 }
 0x567   :  { %2891 = vpow2.f32 %v355_v20 }
 0x571   :  { %v2892_v21 = vpop.eup %2891 }
 0x572   :  { %v357_v22 = vsel %vm350_vm6, %v2892_v21, 0.0 }
 0x573   :  { %358 = vadd.xlane.f32.xlu0 %v357_v22  ;;  %v2866_v22 = vld [vmem:[#allocation3 + $0x6c] sm:$0xff]  }
 0x589   :  { %441 = vrot.lane.b32.xlu0 %v260_v4, %s3008_s1 }
 0x600   :  { %v359_v23 = vpop.xlane.xlu0 %358 }
 0x601   :  { %2893 = vrcp.f32 %v359_v23 }
 0x604   :  { %v442_v26 = vpop.permute.xlu0 %441 }
 0x60b   :  { %v2894_v24 = vpop.eup %2893 }
 0x60c   :  { %v361_v25 = vmul.f32 %v2894_v24, %v2892_v21 }
 0x60e   :  { %2689 = vmatmul.mubr.msk.f32.vlgmr.msra.gmra.mrb[6].mxu1 %vm350_vm6, %v361_v25 }
 0x60f   :  { %2692 = vmatpush3.xpose.msk.msra.mxu1 %vm269_vm5, %v442_v26  ;;  %2693 = vmatprep.mubr.msk.f32.mxu1 %vm3004_vm0, %v3003_v1 }
 0x610   :  { %2696 = vmatprep.subr.mxu1 %v3003_v1 }
 0x612   :  { %2694 = vmatmul.mubr.msk.f32.vlgmr.msra.gmra.mrb[8].mxu1 %vm269_vm5, %v440_v27 }
 0x613   :  { %2698 = vmatprep.mubr.msk.f32.mxu1 %vm3004_vm0, %v3003_v1 }
 0x6e1   :  { %v434_v28 = vpop.f32.mrb[6].mxu1 }
 0x6e2   :  { %438 = vst.msk [vmem:[#allocation2] sm:$0xff] %vm269_vm5, %v434_v28  ;;  %v2690_v29 = vpop.f32.mrb[7].mxu1 }
 0x6e5   :  { %v513_v30 = vpop.f32.mrb[8].mxu1 }
 0x6e6   :  { %v517_v31 = vmul.f32 0.25, %v513_v30  ;;  %v2695_v32 = vpop.f32.mrb[9].mxu1 }
 0x6e8   :  { %v518_v33 = vadd.f32 %v517_v31, %v3108_v12  ;;  %v962_v31 = vld [vmem:[#allocation3 + $0x74] sm:$0x1] }
 0x6e9   :  { %v963_v32 = vunpack.c.l.bf16 %v962_v31 }
 0x6ea   :  { %v519_v34 = vsel %vm350_vm6, %v518_v33, -inf }
 0x6eb   :  { %520 = vmax.xlane.f32.xlu0 %v519_v34 }
 0x701   :  { %530 = vrot.lane.b32.xlu0 %v260_v4, %s3009_s5 }
 0x705   :  { %785 = vrot.lane.b32.xlu0 %v3091_v7, %s3008_s1 }
 0x709   :  { %783 = vrot.lane.b32.xlu0 %v3091_v7, %s3007_s4 }
 0x778   :  { %v521_v35 = vpop.xlane.xlu0 %520 }
 0x779   :  { %v522_v36 = vsub.f32 %v518_v33, %v521_v35  ;;  %v967_v33 = vrot.slane %v963_v32, %v3077_v48 }
 0x77b   :  { %v523_v37 = vmul.f32 1.442695, %v522_v36 }
 0x77c   :  { %v531_v38 = vpop.permute.xlu0 %530 }
 0x77d   :  { %2895 = vpow2.f32 %v523_v37  ;;  %2697 = vmatpush3.msra.mxu1 %v531_v38 }
 0x77e   :  { %2701 = vmatprep.subr.mxu1 %v3003_v1 }
 0x780   :  { %v786_v39 = vpop.permute.xlu0 %785 }
 0x781   :  { %2712 = vmatpush3.xpose.msk.msra.mxu0 %vm269_vm5, %v786_v39 }
 0x782   :  { %2721 = vmatprep.subr.bf16.mxu0 %v3003_v1 }
 0x784   :  { %v784_v40 = vpop.permute.xlu0 %783 }
 0x785   :  { %2714 = vmatmul.mubr.msk.f32.vlgmr.msra.gmra.mrb[4].mxu0 %vm269_vm5, %v784_v40 }
 0x786   :  { %2725 = vmatprep.mubr.msk.bf16.mxu0 %vm3004_vm0, %v3003_v1 }
 0x787   :  { %v2896_v41 = vpop.eup %2895 }
 0x788   :  { %v525_v42 = vsel %vm350_vm6, %v2896_v41, 0.0 }
 0x789   :  { %526 = vadd.xlane.f32.xlu1 %v525_v42 }
 0x79a   :  { %613 = vrot.lane.b32.xlu1 %v3091_v7, %s3006_s0 }
 0x816   :  { %v527_v43 = vpop.xlane.xlu1 %526 }
 0x817   :  { %2897 = vrcp.f32 %v527_v43 }
 0x81a   :  { %v614_v47 = vpop.permute.xlu1 %613 }
 0x821   :  { %v2898_v44 = vpop.eup %2897 }
 0x822   :  { %v529_v45 = vmul.f32 %v2898_v44, %v2896_v41 }
 0x824   :  { %2699 = vmatmul.mubr.msk.f32.vlgmr.msra.gmra.mrb[10].mxu1 %vm350_vm6, %v529_v45 }
 0x825   :  { %2702 = vmatpush3.xpose.msk.msra.mxu1 %vm269_vm5, %v614_v47  ;;  %2703 = vmatprep.mubr.msk.f32.mxu1 %vm3004_vm0, %v3003_v1 }
 0x826   :  { %2706 = vmatprep.subr.mxu1 %v3003_v1 }
 0x828   :  { %2704 = vmatmul.mubr.msk.f32.vlgmr.msra.gmra.mrb[12].mxu1 %vm269_vm5, %v3091_v7 }
 0x829   :  { %2708 = vmatprep.mubr.msk.f32.mxu1 %vm3004_vm0, %v3003_v1 }
 0x858   :  { %v857_v51 = vpop.f32.mrb[4].mxu0 }
 0x859   :  { %v861_v52 = vmul.f32 0.25, %v857_v51  ;;  %v2715_v53 = vpop.f32.mrb[5].mxu0 }
 0x85b   :  { %v862_v54 = vadd.f32 %v861_v52, %v3151_v50 }
 0x85d   :  { %v863_v55 = vsel %vm350_vm6, %v862_v54, -inf }
 0x85e   :  { %864 = vmax.xlane.f32.xlu1 %v863_v55 }
 0x86f   :  { %874 = vrot.lane.b32.xlu1 %v3091_v7, %s3009_s5 }
 0x8eb   :  { %v865_v56 = vpop.xlane.xlu1 %864 }
 0x8ec   :  { %v866_v57 = vsub.f32 %v862_v54, %v865_v56  ;;  %v2867_v56 = vld [vmem:[#allocation3 + $0x80] sm:$0xff]  }
 0x8ee   :  { %v867_v58 = vmul.f32 1.442695, %v866_v57 }
 0x8ef   :  { %v875_v6 = vpop.permute.xlu1 %874 }
 0x8f0   :  { %2899 = vpow2.f32 %v867_v58 }
 0x8f7   :  { %v602_v59 = vpop.f32.mrb[10].mxu1 }
 0x8f8   :  { %v2700_v46 = vpop.f32.mrb[11].mxu1  ;;  %607 = vrot.lane.b32.xlu1 %v602_v59, %s3010_s6 }
 0x8fa   :  { %v2900_v4 = vpop.eup %2899 }
 0x8fb   :  { %v685_v62 = vpop.f32.mrb[12].mxu1  ;;  %v869_v5 = vsel %vm350_vm6, %v2900_v4, 0.0 }
 0x8fc   :  { %v689_v63 = vmul.f32 0.25, %v685_v62  ;;  %v2705_v0 = vpop.f32.mrb[13].mxu1 }
 0x8fd   :  { %v1052_v0 = vld [vmem:[#allocation3 + $0x78] sm:$0x1] }
 0x8fe   :  { %v694_v2 = vadd.f32 %v3151_v50, %v689_v63 }
 0x900   :  { %v695_v3 = vsel %vm350_vm6, %v694_v2, -inf }
 0x901   :  { %696 = vmax.xlane.f32.xlu0 %v695_v3  ;;  %v1060_v3 = vld [vmem:[#allocation3 + $0x7c] sm:$0x1] }
 0x905   :  { %870 = vadd.xlane.f32.xlu0 %v869_v5  ;;  %v1061_v5 = vunpack.c.l.bf16 %v1060_v3 }
 0x96a   :  { %v608_v8 = vpop.permute.xlu1 %607 }
 0x96b   :  { %611 = vst.msk [vmem:[#allocation2] sm:$0xff] %vm610_vm7, %v608_v8 }
 0x972   :  { %v955_v28 = vld [vmem:[#allocation2] sm:$0xff] }
 0x98e   :  { %v697_v9 = vpop.xlane.xlu0 %696 }
 0x98f   :  { %v698_v10 = vsub.f32 %v694_v2, %v697_v9  ;;  %v1053_v2 = vunpack.c.l.bf16 %v1052_v0 }
 0x991   :  { %v699_v11 = vmul.f32 1.442695, %v698_v10 }
 0x992   :  { %v871_v15 = vpop.xlane.xlu0 %870 }
 0x993   :  { %2901 = vpow2.f32 %v699_v11 }
 0x99d   :  { %v2902_v13 = vpop.eup %2901 }
 0x99e   :  { %v701_v14 = vsel %vm350_vm6, %v2902_v13, 0.0 }
 0x99f   :  { %702 = vadd.xlane.f32.xlu0 %v701_v14 }
 0x9b5   :  { %706 = vrot.lane.b32.xlu0 %v3091_v7, %s3000_s22  ;;  %v2865_v7 = vld [vmem:[#allocation3 + $0x64] sm:$0xff]  }
 0x9b6   :  { %2722 = vmatpush3.bf16.msra.mxu0 %v2865_v7  ;;  %v1073_v7 = vld [vmem:[#allocation3 + $0x90] sm:$0x1] }
 0x9b7   :  { %2723 = vmatprep.subr.bf16.mxu0 %v3003_v1 }
 0x9ba   :  { %2724 = vmatpush3.bf16.msra.mxu0 %v2866_v22  ;;  %v1074_v22 = vunpack.c.l.bf16 %v1073_v7 }
 0x9bb   :  { %2737 = vmatprep.subr.bf16.mxu0 %v3003_v1 }
 0xa2c   :  { %v703_v16 = vpop.xlane.xlu0 %702 }
 0xa2d   :  { %2903 = vrcp.f32 %v703_v16 }
 0xa2e   :  { %2905 = vrcp.f32 %v871_v15 }
 0xa30   :  { %v707_v17 = vpop.permute.xlu0 %706 }
 0xa31   :  { %2707 = vmatpush3.msra.mxu1 %v707_v17 }
 0xa32   :  { %2716 = vmatprep.subr.mxu1 %v3003_v1 }
 0xa37   :  { %v2904_v18 = vpop.eup %2903 }
 0xa38   :  { %v705_v19 = vmul.f32 %v2904_v18, %v2902_v13  ;;  %v2906_v20 = vpop.eup %2905  ;;  %v1065_v13 = vrot.slane %v1061_v5, %v3077_v48  ;;  %v2869_v18 = vld [vmem:[#allocation3 + $0x94] sm:$0xff]  }
 0xa39   :  { %v873_v21 = vmul.f32 %v2906_v20, %v2900_v4  ;;  %v1057_v4 = vrot.slane %v1053_v2, %v3077_v48  ;;  %v2871_v20 = vld [vmem:[#allocation3 + $0xa4] sm:$0xff]  }
 0xa3a   :  { %2709 = vmatmul.mubr.msk.f32.vlgmr.msra.gmra.mrb[14].mxu1 %vm350_vm6, %v705_v19  ;;  %v2870_v19 = vld [vmem:[#allocation3 + $0x9c] sm:$0xff]  }
 0xa3b   :  { %2717 = vmatpush3.msra.mxu1 %v875_v6  ;;  %2718 = vmatprep.mubr.msk.f32.mxu1 %vm3004_vm0, %v3003_v1 }
 0xa3c   :  { %2729 = vmatprep.subr.bf16.mxu1 %v3003_v1 }
 0xa3e   :  { %2719 = vmatmul.mubr.msk.f32.vlgmr.msra.gmra.mrb[16].mxu1 %vm350_vm6, %v873_v21  ;;  %v2872_v21 = vld [vmem:[#allocation3 + $0xac] sm:$0xff]  }
 0xa3f   :  { %2733 = vmatprep.mubr.msk.bf16.mxu1 %vm3004_vm0, %v3003_v1  ;;  %2730 = vmatpush3.bf16.msra.mxu1 %v2867_v56 }
 0xa40   :  { %2731 = vmatprep.subr.bf16.mxu1 %v3003_v1 }
 0xb0d   :  { %v778_v23 = vpop.f32.mrb[14].mxu1 }
 0xb0e   :  { %782 = vst.msk [vmem:[#allocation2 + $0x8] sm:$0xff] %vm269_vm5, %v778_v23  ;;  %v2710_v24 = vpop.f32.mrb[15].mxu1  ;;  %v1078_v23 = vrot.slane %v1074_v22, %v3077_v48  ;;  %v1273_v22 = vld [vmem:[#allocation3 + $0xbc] sm:$0x1] }
 0xb11   :  { %v946_v25 = vpop.f32.mrb[16].mxu1 }
 0xb12   :  { %951 = vrot.lane.b32.xlu0 %v946_v25, %s3010_s6  ;;  %v2720_v26 = vpop.f32.mrb[17].mxu1 }
 0xb84   :  { %v952_v27 = vpop.permute.xlu0 %951 }
 0xb85   :  { %954 = vst.msk [vmem:[#allocation2 + $0x8] sm:$0xff] %vm610_vm7, %v952_v27 }
 0xb8c   :  { %v956_v29 = vld [vmem:[#allocation2 + $0x8] sm:$0xff] }
 0xb8d   :  { %v957_v30 = vpack.c.bf16 %v956_v29, %v955_v28 }
 0xb8f   :  { %2726 = vmatmul.mubr.msk.bf16.vlgmr.msra.gmra.mrb[8].mxu0 %vm154_vm4, %v957_v30 }
 0xb90   :  { %2745 = vmatprep.mubr.msk.bf16.mxu0 %vm3004_vm0, %v3003_v1  ;;  %2738 = vmatpush3.bf16.msra.mxu0 %v2869_v18 }
 0xb91   :  { %2739 = vmatprep.subr.bf16.mxu0 %v3003_v1 }
 0xb94   :  { %2740 = vmatpush3.bf16.msra.mxu0 %v2870_v19 }
 0xb95   :  { %2741 = vmatprep.subr.bf16.mxu0 %v3003_v1 }
 0xb98   :  { %2742 = vmatpush3.bf16.msra.mxu0 %v2871_v20 }
 0xb99   :  { %2743 = vmatprep.subr.bf16.mxu0 %v3003_v1 }
 0xb9c   :  { %2744 = vmatpush3.bf16.msra.mxu0 %v2872_v21  ;;  %v1265_v21 = vld [vmem:[#allocation3 + $0xb8] sm:$0x1] }
 0xb9d   :  { %2767 = vmatprep.subr.mxu0 %v3003_v1  ;;  %v1266_v7 = vunpack.c.l.bf16 %v1265_v21 }
 0xc62   :  { %v1017_v34 = vpop.f32.mrb[8].mxu0 }
 0xc63   :  { %v1018_v35 = vadd.f32 %v1017_v34, %v967_v33  ;;  %v2727_v36 = vpop.f32.mrb[9].mxu0 }
 0xc64   :  { %v1020_v37 = vpop.f32.mrb[10].mxu0 }
 0xc65   :  { %v1021_v38 = vadd.f32 %v1020_v37, %v967_v33  ;;  %v2728_v39 = vpop.f32.mrb[11].mxu0  ;;  %v1024_v40 = vadd.f32 %v1018_v35, %v3081_v60 }
 0xc67   :  { %v1026_v41 = vsel %vm154_vm4, %v1024_v40, 0.0  ;;  %v1025_v42 = vadd.f32 %v1021_v38, %v3083_v61  ;;  %v2868_v61 = vld [vmem:[#allocation3 + $0x88] sm:$0xff]  }
 0xc68   :  { %1027 = vadd.xlane.f32.xlu1 %v1026_v41  ;;  %2732 = vmatpush3.bf16.msra.mxu1 %v2868_v61 }
 0xc69   :  { %v1029_v43 = vsel %vm154_vm4, %v1025_v42, 0.0  ;;  %2749 = vmatprep.subr.bf16.mxu1 %v3003_v1 }
 0xc6a   :  { %1030 = vadd.xlane.f32.xlu0 %v1029_v43 }
 0xcf5   :  { %v1028_v44 = vpop.xlane.xlu1 %1027 }
 0xcf6   :  { %v1032_v45 = vmul.f32 0.03125, %v1028_v44 }
 0xcf7   :  { %v1031_v47 = vpop.xlane.xlu0 %1030 }
 0xcf8   :  { %v1034_v49 = vsub.f32 %v1024_v40, %v1032_v45  ;;  %v1033_v51 = vmul.f32 0.03125, %v1031_v47 }
 0xcfa   :  { %v1035_v52 = vsub.f32 %v1025_v42, %v1033_v51  ;;  %v1036_v53 = vmul.f32 %v1034_v49, %v1034_v49 }
 0xcfc   :  { %v1038_v54 = vsel %vm154_vm4, %v1036_v53, 0.0  ;;  %v1037_v55 = vmul.f32 %v1035_v52, %v1035_v52 }
 0xcfd   :  { %1039 = vadd.xlane.f32.xlu0 %v1038_v54 }
 0xcfe   :  { %v1041_v60 = vsel %vm154_vm4, %v1037_v55, 0.0 }
 0xcff   :  { %1042 = vadd.xlane.f32.xlu1 %v1041_v60 }
 0xd8a   :  { %v1040_v57 = vpop.xlane.xlu0 %1039 }
 0xd8b   :  { %v1044_v58 = vmul.f32 0.03125, %v1040_v57 }
 0xd8c   :  { %v1043_v59 = vpop.xlane.xlu1 %1042 }
 0xd8d   :  { %v1046_v46 = vadd.f32 1e-12, %v1044_v58  ;;  %v1045_v62 = vmul.f32 0.03125, %v1043_v59 }
 0xd8f   :  { %2907 = vrsqrt.f32 %v1046_v46  ;;  %v1047_v63 = vadd.f32 1e-12, %v1045_v62 }
 0xd91   :  { %2909 = vrsqrt.f32 %v1047_v63 }
 0xd99   :  { %v2908_v6 = vpop.eup %2907 }
 0xd9a   :  { %v1050_v8 = vmul.f32 %v2908_v6, %v1034_v49 }
 0xd9b   :  { %v2910_v9 = vpop.eup %2909 }
 0xd9c   :  { %v1058_v10 = vmul.f32 %v1057_v4, %v1050_v8  ;;  %v1051_v11 = vmul.f32 %v2910_v9, %v1035_v52  ;;  %v1162_v52 = vld [vmem:[#allocation3 + $0xb4] sm:$0x1] }
 0xd9d   :  { %v1163_v53 = vunpack.c.l.bf16 %v1162_v52 }
 0xd9e   :  { %v1059_v14 = vmul.f32 %v1057_v4, %v1051_v11  ;;  %v1066_v15 = vadd.f32 %v1065_v13, %v1058_v10 }
 0xd9f   :  { %v1167_v54 = vrot.slane %v1163_v53, %v3077_v48 }
 0xda0   :  { %v1067_v16 = vadd.f32 %v1065_v13, %v1059_v14  ;;  %v2873_v13 = vld [vmem:[#allocation3 + $0xc0] sm:$0xff]   ;;  %v2874_v14 = vld [vmem:[#allocation3 + $0xc8] sm:$0xff]  }
 0xda2   :  { %v1068_v17 = vpack.c.bf16 %v1067_v16, %v1066_v15 }
 0xda4   :  { %2734 = vmatmul.mubr.msk.bf16.vlgmr.msra.gmra.mrb[20].mxu1 %vm154_vm4, %v1068_v17 }
 0xda5   :  { %2753 = vmatprep.mubr.msk.bf16.mxu1 %vm3004_vm0, %v3003_v1  ;;  %2750 = vmatpush3.bf16.msra.mxu1 %v2873_v13 }
 0xda6   :  { %2751 = vmatprep.subr.bf16.mxu1 %v3003_v1 }
 0xda9   :  { %2752 = vmatpush3.bf16.msra.mxu1 %v2874_v14 }
 0xdaa   :  { %2757 = vmatprep.subr.mxu1 %v3003_v1 }
 0xe77   :  { %v1128_v24 = vpop.f32.mrb[20].mxu1 }
 0xe78   :  { %v1129_v25 = vadd.f32 %v1128_v24, %v1078_v23  ;;  %v2735_v26 = vpop.f32.mrb[21].mxu1  ;;  %v1274_v24 = vunpack.c.l.bf16 %v1273_v22 }
 0xe79   :  { %v1131_v27 = vpop.f32.mrb[22].mxu1 }
 0xe7a   :  { %v1137_v28 = vmul.f32 0.044715, %v1129_v25  ;;  %v1132_v29 = vadd.f32 %v1131_v27, %v1078_v23  ;;  %v2736_v30 = vpop.f32.mrb[23].mxu1  ;;  %v1135_v43 = vmul.f32 0.5, %v1129_v25  ;;  %v1270_v23 = vrot.slane %v1266_v7, %v3077_v48 }
 0xe7b   :  { %v1278_v30 = vrot.slane %v1274_v24, %v3077_v48 }
 0xe7c   :  { %v1139_v31 = vmul.f32 %v1137_v28, %v1129_v25  ;;  %v1138_v32 = vmul.f32 0.044715, %v1132_v29  ;;  %v1136_v44 = vmul.f32 0.5, %v1132_v29 }
 0xe7e   :  { %v1141_v33 = vmul.f32 %v1139_v31, %v1129_v25  ;;  %v1140_v34 = vmul.f32 %v1138_v32, %v1132_v29 }
 0xe80   :  { %v1143_v35 = vadd.f32 %v1141_v33, %v1129_v25  ;;  %v1142_v36 = vmul.f32 %v1140_v34, %v1132_v29 }
 0xe82   :  { %v1145_v37 = vmul.f32 0.7978846, %v1143_v35  ;;  %v1144_v38 = vadd.f32 %v1142_v36, %v1132_v29  ;;  %v1286_v35 = vld [vmem:[#allocation3 + $0xd0] sm:$0x1] }
 0xe83   :  { %v1287_v36 = vunpack.c.l.bf16 %v1286_v35 }
 0xe84   :  { %2911 = vtanh.f32 %v1145_v37  ;;  %v1146_v39 = vmul.f32 0.7978846, %v1144_v38 }
 0xe85   :  { %v1291_v37 = vrot.slane %v1287_v36, %v3077_v48 }
 0xe86   :  { %2913 = vtanh.f32 %v1146_v39 }
 0xe8e   :  { %v2912_v40 = vpop.eup %2911 }
 0xe8f   :  { %v1149_v41 = vadd.f32 1.0, %v2912_v40 }
 0xe90   :  { %v2914_v42 = vpop.eup %2913 }
 0xe91   :  { %v1150_v45 = vadd.f32 1.0, %v2914_v42  ;;  %v1151_v47 = vmul.f32 %v1149_v41, %v1135_v43 }
 0xe93   :  { %v1152_v49 = vmul.f32 %v1150_v45, %v1136_v44 }
 0xe95   :  { %v1153_v51 = vpack.c.bf16 %v1152_v49, %v1151_v47 }
 0xe97   :  { %2746 = vmatmul.mubr.msk.bf16.vlgmr.msra.gmra.mrb[12].mxu0 %vm1192_vm8, %v1153_v51 }
 0xe98   :  { %2769 = vmatprep.mubr.msk.f32.mxu0 %vm3004_vm0, %v3003_v1 }
 0xf6a   :  { %v1230_v55 = vpop.f32.mrb[12].mxu0 }
 0xf6b   :  { %v1231_v60 = vadd.f32 %v1230_v55, %v1167_v54  ;;  %v2747_v56 = vpop.f32.mrb[13].mxu0 }
 0xf6c   :  { %v1233_v61 = vpop.f32.mrb[14].mxu0 }
 0xf6d   :  { %v1234_v57 = vadd.f32 %v1233_v61, %v1167_v54  ;;  %v2748_v58 = vpop.f32.mrb[15].mxu0  ;;  %v1237_v59 = vadd.f32 %v1231_v60, %v1066_v15 }
 0xf6f   :  { %v1239_v46 = vsel %vm154_vm4, %v1237_v59, 0.0  ;;  %v1238_v62 = vadd.f32 %v1234_v57, %v1067_v16 }
 0xf70   :  { %1240 = vadd.xlane.f32.xlu0 %v1239_v46 }
 0xf71   :  { %v1242_v63 = vsel %vm154_vm4, %v1238_v62, 0.0 }
 0xf72   :  { %1243 = vadd.xlane.f32.xlu1 %v1242_v63 }
 0xffd   :  { %v1241_v0 = vpop.xlane.xlu0 %1240 }
 0xffe   :  { %v1245_v2 = vmul.f32 0.03125, %v1241_v0 }
 0xfff   :  { %v1244_v3 = vpop.xlane.xlu1 %1243 }
0x1000   :  { %v1247_v4 = vsub.f32 %v1237_v59, %v1245_v2  ;;  %v1246_v5 = vmul.f32 0.03125, %v1244_v3 }
0x1002   :  { %v1248_v6 = vsub.f32 %v1238_v62, %v1246_v5  ;;  %v1249_v8 = vmul.f32 %v1247_v4, %v1247_v4 }
0x1004   :  { %v1251_v9 = vsel %vm154_vm4, %v1249_v8, 0.0  ;;  %v1250_v10 = vmul.f32 %v1248_v6, %v1248_v6 }
0x1005   :  { %1252 = vadd.xlane.f32.xlu0 %v1251_v9 }
0x1006   :  { %v1254_v11 = vsel %vm154_vm4, %v1250_v10, 0.0 }
0x1007   :  { %1255 = vadd.xlane.f32.xlu1 %v1254_v11 }
0x1092   :  { %v1253_v15 = vpop.xlane.xlu0 %1252 }
0x1093   :  { %v1257_v16 = vmul.f32 0.03125, %v1253_v15 }
0x1094   :  { %v1256_v17 = vpop.xlane.xlu1 %1255 }
0x1095   :  { %v1259_v18 = vadd.f32 1e-12, %v1257_v16  ;;  %v1258_v19 = vmul.f32 0.03125, %v1256_v17 }
0x1097   :  { %2915 = vrsqrt.f32 %v1259_v18  ;;  %v1260_v20 = vadd.f32 1e-12, %v1258_v19 }
0x1099   :  { %2917 = vrsqrt.f32 %v1260_v20 }
0x10a1   :  { %v2916_v25 = vpop.eup %2915 }
0x10a2   :  { %v1263_v26 = vmul.f32 %v2916_v25, %v1247_v4 }
0x10a3   :  { %v2918_v27 = vpop.eup %2917 }
0x10a4   :  { %v1271_v28 = vmul.f32 %v1270_v23, %v1263_v26  ;;  %v1264_v29 = vmul.f32 %v2918_v27, %v1248_v6 }
0x10a6   :  { %v1272_v31 = vmul.f32 %v1270_v23, %v1264_v29  ;;  %v3212_v32 = vadd.f32 %v1278_v30, %v1271_v28 }
0x10a8   :  { %v3214_v33 = vadd.f32 %v1278_v30, %v1272_v31 }
0x10aa   :  { %v1281_v34 = vpack.c.bf16 %v3214_v33, %v3212_v32 }
0x10ac   :  { %2754 = vmatmul.mubr.msk.bf16.vlgmr.msra.gmra.mrb[24].mxu1 %vm154_vm4, %v1281_v34 }
0x10ad   :  { %2759 = vmatprep.mubr.msk.f32.mxu1 %vm3004_vm0, %v3003_v1 }
0x117f   :  { %v1341_v38 = vpop.f32.mrb[24].mxu1 }
0x1180   :  { %v3222_v39 = vadd.f32 %v1341_v38, %v1291_v37  ;;  %v2755_v40 = vpop.f32.mrb[25].mxu1 }
0x1181   :  { %v1344_v41 = vpop.f32.mrb[26].mxu1 }
0x1182   :  { %1517 = vrot.lane.b32.xlu1 %v3222_v39, %s3008_s1  ;;  %1349 = vrot.lane.b32.xlu0 %v3222_v39, %s3006_s0  ;;  %v2756_v42 = vpop.f32.mrb[27].mxu1  ;;  %v3228_v43 = vadd.f32 %v1344_v41, %v1291_v37 }
0x1186   :  { %1515 = vrot.lane.b32.xlu1 %v3222_v39, %s3007_s4  ;;  %1688 = vrot.lane.b32.xlu0 %v3228_v43, %s3006_s0 }
0x118a   :  { %1856 = vrot.lane.b32.xlu1 %v3228_v43, %s3008_s1  ;;  %1854 = vrot.lane.b32.xlu0 %v3228_v43, %s3007_s4 }
0x11f4   :  { %v1518_v44 = vpop.permute.xlu1 %1517  ;;  %v1350_v45 = vpop.permute.xlu0 %1349 }
0x11f5   :  { %2758 = vmatpush3.xpose.msk.msra.mxu1 %vm269_vm5, %v1350_v45  ;;  %2768 = vmatpush3.xpose.msk.msra.mxu0 %vm269_vm5, %v1518_v44 }
0x11f6   :  { %2777 = vmatprep.subr.mxu0 %v3003_v1  ;;  %2762 = vmatprep.subr.mxu1 %v3003_v1 }
0x11f8   :  { %v1516_v47 = vpop.permute.xlu1 %1515  ;;  %2760 = vmatmul.mubr.msk.f32.vlgmr.msra.gmra.mrb[18].mxu1 %vm269_vm5, %v3222_v39  ;;  %v1689_v49 = vpop.permute.xlu0 %1688 }
0x11f9   :  { %2770 = vmatmul.mubr.msk.f32.vlgmr.msra.gmra.mrb[6].mxu0 %vm269_vm5, %v1516_v47  ;;  %2764 = vmatprep.mubr.msk.f32.mxu1 %vm3004_vm0, %v3003_v1 }
0x11fa   :  { %2778 = vmatpush3.xpose.msk.msra.mxu0 %vm269_vm5, %v1689_v49  ;;  %2779 = vmatprep.mubr.msk.f32.mxu0 %vm3004_vm0, %v3003_v1 }
0x11fb   :  { %2787 = vmatprep.subr.mxu0 %v3003_v1 }
0x11fc   :  { %v1857_v51 = vpop.permute.xlu1 %1856  ;;  %v1855_v52 = vpop.permute.xlu0 %1854 }
0x11fd   :  { %2780 = vmatmul.mubr.msk.f32.vlgmr.msra.gmra.mrb[16].mxu0 %vm269_vm5, %v3228_v43 }
0x11fe   :  { %2788 = vmatpush3.xpose.msk.msra.mxu0 %vm269_vm5, %v1857_v51  ;;  %2789 = vmatprep.mubr.msk.f32.mxu0 %vm3004_vm0, %v3003_v1 }
0x11ff   :  { %2797 = vmatprep.subr.bf16.mxu0 %v3003_v1 }
0x1201   :  { %2790 = vmatmul.mubr.msk.f32.vlgmr.msra.gmra.mrb[18].mxu0 %vm269_vm5, %v1855_v52 }
0x1202   :  { %2801 = vmatprep.mubr.msk.bf16.mxu0 %vm3004_vm0, %v3003_v1 }
0x12cb   :  { %v1421_v53 = vpop.f32.mrb[18].mxu1 }
0x12cc   :  { %v1425_v54 = vmul.f32 0.25, %v1421_v53  ;;  %v2761_v55 = vpop.f32.mrb[19].mxu1  ;;  %v1589_v60 = vpop.f32.mrb[6].mxu0  ;;  %v2875_v53 = vld [vmem:[#allocation3 + $0xd4] sm:$0xff]  }
0x12cd   :  { %v1593_v56 = vmul.f32 0.25, %v1589_v60  ;;  %v2771_v61 = vpop.f32.mrb[7].mxu0  ;;  %2798 = vmatpush3.bf16.msra.mxu0 %v2875_v53 }
0x12ce   :  { %v1426_v57 = vadd.f32 %v1425_v54, %v3108_v12  ;;  %v2876_v54 = vld [vmem:[#allocation3 + $0xdc] sm:$0xff]   ;;  %2799 = vmatprep.subr.bf16.mxu0 %v3003_v1 }
0x12cf   :  { %v1594_v58 = vadd.f32 %v1593_v56, %v3108_v12 }
0x12d0   :  { %v1760_v59 = vpop.f32.mrb[16].mxu0  ;;  %v1427_v46 = vsel %vm350_vm6, %v1426_v57, -inf }
0x12d1   :  { %v1764_v62 = vmul.f32 0.25, %v1760_v59  ;;  %1428 = vmax.xlane.f32.xlu1 %v1427_v46  ;;  %v2781_v63 = vpop.f32.mrb[17].mxu0  ;;  %v1595_v0 = vsel %vm350_vm6, %v1594_v58, -inf  ;;  %2800 = vmatpush3.bf16.msra.mxu0 %v2876_v54 }
0x12d2   :  { %1596 = vmax.xlane.f32.xlu0 %v1595_v0  ;;  %2813 = vmatprep.subr.bf16.mxu0 %v3003_v1  ;;  %v2033_v63 = vld [vmem:[#allocation3 + $0xe4] sm:$0x1] }
0x12d3   :  { %v1765_v2 = vadd.f32 %v1764_v62, %v3151_v50  ;;  %v2034_v0 = vunpack.c.l.bf16 %v2033_v63 }
0x12d4   :  { %v1928_v3 = vpop.f32.mrb[18].mxu0 }
0x12d5   :  { %v1932_v4 = vmul.f32 0.25, %v1928_v3  ;;  %v2791_v5 = vpop.f32.mrb[19].mxu0  ;;  %v1766_v6 = vsel %vm350_vm6, %v1765_v2, -inf }
0x12d6   :  { %1767 = vmax.xlane.f32.xlu0 %v1766_v6 }
0x12d7   :  { %v1933_v8 = vadd.f32 %v1932_v4, %v3151_v50 }
0x12d9   :  { %v1934_v12 = vsel %vm350_vm6, %v1933_v8, -inf }
0x12da   :  { %1935 = vmax.xlane.f32.xlu1 %v1934_v12 }
0x12eb   :  { %1606 = vrot.lane.b32.xlu1 %v3222_v39, %s3009_s5 }
0x135e   :  { %v1429_v9 = vpop.xlane.xlu1 %1428 }
0x135f   :  { %v1430_v10 = vsub.f32 %v1426_v57, %v1429_v9  ;;  %v1597_v11 = vpop.xlane.xlu0 %1596 }
0x1360   :  { %v1598_v13 = vsub.f32 %v1594_v58, %v1597_v11 }
0x1361   :  { %v1431_v14 = vmul.f32 1.442695, %v1430_v10 }
0x1362   :  { %v1599_v15 = vmul.f32 1.442695, %v1598_v13 }
0x1363   :  { %2919 = vpow2.f32 %v1431_v14  ;;  %v1768_v23 = vpop.xlane.xlu0 %1767 }
0x1364   :  { %2921 = vpow2.f32 %v1599_v15  ;;  %v1769_v24 = vsub.f32 %v1765_v2, %v1768_v23  ;;  %v2038_v2 = vrot.slane %v2034_v0, %v3077_v48 }
0x1366   :  { %v1770_v25 = vmul.f32 1.442695, %v1769_v24 }
0x1367   :  { %v1936_v16 = vpop.xlane.xlu1 %1935 }
0x1368   :  { %v1937_v17 = vsub.f32 %v1933_v8, %v1936_v16 }
0x136a   :  { %v1938_v18 = vmul.f32 1.442695, %v1937_v17 }
0x136b   :  { %v1607_v28 = vpop.permute.xlu1 %1606 }
0x136c   :  { %2923 = vpow2.f32 %v1938_v18 }
0x136d   :  { %v2920_v19 = vpop.eup %2919  ;;  %2925 = vpow2.f32 %v1770_v25 }
0x136e   :  { %v2922_v50 = vpop.eup %2921  ;;  %v1433_v20 = vsel %vm350_vm6, %v2920_v19, 0.0 }
0x136f   :  { %1434 = vadd.xlane.f32.xlu0 %v1433_v20  ;;  %v1601_v21 = vsel %vm350_vm6, %v2922_v50, 0.0 }
0x1370   :  { %1602 = vadd.xlane.f32.xlu1 %v1601_v21 }
0x1376   :  { %v2924_v7 = vpop.eup %2923 }
0x1377   :  { %v1940_v22 = vsel %vm350_vm6, %v2924_v7, 0.0  ;;  %v2926_v26 = vpop.eup %2925 }
0x1378   :  { %1941 = vadd.xlane.f32.xlu1 %v1940_v22  ;;  %v1772_v27 = vsel %vm350_vm6, %v2926_v26, 0.0 }
0x1385   :  { %1438 = vrot.lane.b32.xlu0 %v3222_v39, %s3000_s22 }
0x1389   :  { %1777 = vrot.lane.b32.xlu1 %v3228_v43, %s3000_s22 }
0x13a4   :  { %1773 = vadd.xlane.f32.xlu0 %v1772_v27 }
0x13ba   :  { %1945 = vrot.lane.b32.xlu0 %v3228_v43, %s3009_s5 }
0x13fc   :  { %v1435_v29 = vpop.xlane.xlu0 %1434 }
0x13fd   :  { %2927 = vrcp.f32 %v1435_v29  ;;  %v1603_v30 = vpop.xlane.xlu1 %1602 }
0x13fe   :  { %2929 = vrcp.f32 %v1603_v30  ;;  %v2131_v30 = vld [vmem:[#allocation3 + $0xec] sm:$0x1] }
0x1400   :  { %v1439_v31 = vpop.permute.xlu0 %1438 }
0x1401   :  { %2763 = vmatpush3.msra.mxu1 %v1439_v31 }
0x1402   :  { %2772 = vmatprep.subr.mxu1 %v3003_v1 }
0x1405   :  { %v1942_v36 = vpop.xlane.xlu1 %1941 }
0x1407   :  { %v2928_v34 = vpop.eup %2927 }
0x1408   :  { %v1437_v35 = vmul.f32 %v2928_v34, %v2920_v19  ;;  %v2930_v37 = vpop.eup %2929  ;;  %v2132_v34 = vunpack.c.l.bf16 %v2131_v30 }
0x1409   :  { %v1605_v38 = vmul.f32 %v2930_v37, %v2922_v50  ;;  %v1778_v39 = vpop.permute.xlu1 %1777 }
0x140a   :  { %2765 = vmatmul.mubr.msk.f32.vlgmr.msra.gmra.mrb[28].mxu1 %vm350_vm6, %v1437_v35 }
0x140b   :  { %2773 = vmatpush3.msra.mxu1 %v1607_v28  ;;  %2774 = vmatprep.mubr.msk.f32.mxu1 %vm3004_vm0, %v3003_v1  ;;  %v2123_v28 = vld [vmem:[#allocation3 + $0xe8] sm:$0x1] }
0x140c   :  { %2782 = vmatprep.subr.mxu1 %v3003_v1  ;;  %v2124_v29 = vunpack.c.l.bf16 %v2123_v28 }
0x140e   :  { %2775 = vmatmul.mubr.msk.f32.vlgmr.msra.gmra.mrb[30].mxu1 %vm350_vm6, %v1605_v38  ;;  %v2128_v31 = vrot.slane %v2124_v29, %v3077_v48 }
0x140f   :  { %2783 = vmatpush3.msra.mxu1 %v1778_v39  ;;  %2784 = vmatprep.mubr.msk.f32.mxu1 %vm3004_vm0, %v3003_v1 }
0x1410   :  { %2792 = vmatprep.subr.mxu1 %v3003_v1 }
0x1431   :  { %v1774_v40 = vpop.xlane.xlu0 %1773 }
0x1432   :  { %2931 = vrcp.f32 %v1774_v40  ;;  %v2136_v40 = vrot.slane %v2132_v34, %v3077_v48 }
0x1433   :  { %2933 = vrcp.f32 %v1942_v36 }
0x1435   :  { %v1946_v44 = vpop.permute.xlu0 %1945 }
0x143c   :  { %v2932_v41 = vpop.eup %2931 }
0x143d   :  { %v1776_v42 = vmul.f32 %v2932_v41, %v2926_v26  ;;  %v2934_v43 = vpop.eup %2933 }
0x143e   :  { %v1944_v45 = vmul.f32 %v2934_v43, %v2924_v7  ;;  %v2877_v7 = vld [vmem:[#allocation3 + $0xf0] sm:$0xff]  }
0x143f   :  { %2785 = vmatmul.mubr.msk.f32.vlgmr.msra.gmra.mrb[32].mxu1 %vm350_vm6, %v1776_v42 }
0x1440   :  { %2793 = vmatpush3.msra.mxu1 %v1946_v44  ;;  %2794 = vmatprep.mubr.msk.f32.mxu1 %vm3004_vm0, %v3003_v1 }
0x1441   :  { %2805 = vmatprep.subr.bf16.mxu1 %v3003_v1 }
0x1443   :  { %2795 = vmatmul.mubr.msk.f32.vlgmr.msra.gmra.mrb[34].mxu1 %vm350_vm6, %v1944_v45  ;;  %v2879_v45 = vld [vmem:[#allocation3 + $0x104] sm:$0xff]  }
0x1444   :  { %2809 = vmatprep.mubr.msk.bf16.mxu1 %vm3004_vm0, %v3003_v1  ;;  %2806 = vmatpush3.bf16.msra.mxu1 %v2877_v7 }
0x1445   :  { %2807 = vmatprep.subr.bf16.mxu1 %v3003_v1 }
0x14dd   :  { %v1510_v47 = vpop.f32.mrb[28].mxu1 }
0x14de   :  { %1514 = vst.msk [vmem:[#allocation2] sm:$0xff] %vm269_vm5, %v1510_v47  ;;  %v2766_v49 = vpop.f32.mrb[29].mxu1  ;;  %v2880_v47 = vld [vmem:[#allocation3 + $0x10c] sm:$0xff]  }
0x14df   :  { %v2881_v49 = vld [vmem:[#allocation3 + $0x114] sm:$0xff]  }
0x14e1   :  { %v1678_v51 = vpop.f32.mrb[30].mxu1 }
0x14e2   :  { %1683 = vrot.lane.b32.xlu1 %v1678_v51, %s3010_s6  ;;  %v2776_v52 = vpop.f32.mrb[31].mxu1  ;;  %v2882_v51 = vld [vmem:[#allocation3 + $0x11c] sm:$0xff]  }
0x14e3   :  { %v2144_v52 = vld [vmem:[#allocation3 + $0x100] sm:$0x1] }
0x14e4   :  { %v2145_v53 = vunpack.c.l.bf16 %v2144_v52 }
0x14e6   :  { %v2149_v54 = vrot.slane %v2145_v53, %v3077_v48 }
0x1512   :  { %v1849_v55 = vpop.f32.mrb[32].mxu1 }
0x1513   :  { %1853 = vst.msk [vmem:[#allocation2 + $0x8] sm:$0xff] %vm269_vm5, %v1849_v55  ;;  %v2786_v60 = vpop.f32.mrb[33].mxu1 }
0x1516   :  { %v2017_v56 = vpop.f32.mrb[34].mxu1 }
0x1517   :  { %2022 = vrot.lane.b32.xlu0 %v2017_v56, %s3010_s6  ;;  %v2796_v61 = vpop.f32.mrb[35].mxu1 }
0x1554   :  { %v1684_v57 = vpop.permute.xlu1 %1683 }
0x1555   :  { %1686 = vst.msk [vmem:[#allocation2] sm:$0xff] %vm610_vm7, %v1684_v57 }
0x155c   :  { %v2026_v59 = vld [vmem:[#allocation2] sm:$0xff] }
0x1589   :  { %v2023_v58 = vpop.permute.xlu0 %2022 }
0x158a   :  { %2025 = vst.msk [vmem:[#allocation2 + $0x8] sm:$0xff] %vm610_vm7, %v2023_v58 }
0x1591   :  { %v2027_v46 = vld [vmem:[#allocation2 + $0x8] sm:$0xff] }
0x1592   :  { %v2028_v62 = vpack.c.bf16 %v2027_v46, %v2026_v59 }
0x1594   :  { %2802 = vmatmul.mubr.msk.bf16.vlgmr.msra.gmra.mrb[20].mxu0 %vm154_vm4, %v2028_v62 }
0x1595   :  { %2821 = vmatprep.mubr.msk.bf16.mxu0 %vm3004_vm0, %v3003_v1  ;;  %2814 = vmatpush3.bf16.msra.mxu0 %v2879_v45 }
0x1596   :  { %2815 = vmatprep.subr.bf16.mxu0 %v3003_v1 }
0x1599   :  { %2816 = vmatpush3.bf16.msra.mxu0 %v2880_v47  ;;  %v2335_v47 = vld [vmem:[#allocation3 + $0x128] sm:$0x1] }
0x159a   :  { %2817 = vmatprep.subr.bf16.mxu0 %v3003_v1 }
0x159d   :  { %2818 = vmatpush3.bf16.msra.mxu0 %v2881_v49  ;;  %v2336_v49 = vunpack.c.l.bf16 %v2335_v47 }
0x159e   :  { %2819 = vmatprep.subr.bf16.mxu0 %v3003_v1 }
0x159f   :  { %v2340_v52 = vrot.slane %v2336_v49, %v3077_v48 }
0x15a1   :  { %2820 = vmatpush3.bf16.msra.mxu0 %v2882_v51  ;;  %v2343_v51 = vld [vmem:[#allocation3 + $0x12c] sm:$0x1] }
0x15a2   :  { %v2344_v53 = vunpack.c.l.bf16 %v2343_v51 }
0x1667   :  { %v2088_v3 = vpop.f32.mrb[20].mxu0 }
0x1668   :  { %v2089_v4 = vadd.f32 %v2088_v3, %v2038_v2  ;;  %v2803_v5 = vpop.f32.mrb[21].mxu0 }
0x1669   :  { %v2091_v6 = vpop.f32.mrb[22].mxu0 }
0x166a   :  { %v2092_v8 = vadd.f32 %v2091_v6, %v2038_v2  ;;  %v2804_v12 = vpop.f32.mrb[23].mxu0  ;;  %v2095_v9 = vadd.f32 %v2089_v4, %v3212_v32 }
0x166c   :  { %v2097_v10 = vsel %vm154_vm4, %v2095_v9, 0.0  ;;  %v2096_v11 = vadd.f32 %v2092_v8, %v3214_v33  ;;  %v2878_v33 = vld [vmem:[#allocation3 + $0xf8] sm:$0xff]  }
0x166d   :  { %2098 = vadd.xlane.f32.xlu1 %v2097_v10  ;;  %2808 = vmatpush3.bf16.msra.mxu1 %v2878_v33 }
0x166e   :  { %v2100_v13 = vsel %vm154_vm4, %v2096_v11, 0.0  ;;  %2825 = vmatprep.subr.bf16.mxu1 %v3003_v1 }
0x166f   :  { %2101 = vadd.xlane.f32.xlu0 %v2100_v13 }
0x16fa   :  { %v2099_v14 = vpop.xlane.xlu1 %2098 }
0x16fb   :  { %v2103_v15 = vmul.f32 0.03125, %v2099_v14 }
0x16fc   :  { %v2102_v16 = vpop.xlane.xlu0 %2101 }
0x16fd   :  { %v2105_v17 = vsub.f32 %v2095_v9, %v2103_v15  ;;  %v2104_v18 = vmul.f32 0.03125, %v2102_v16 }
0x16ff   :  { %v2106_v19 = vsub.f32 %v2096_v11, %v2104_v18  ;;  %v2107_v50 = vmul.f32 %v2105_v17, %v2105_v17 }
0x1701   :  { %v2109_v20 = vsel %vm154_vm4, %v2107_v50, 0.0  ;;  %v2108_v21 = vmul.f32 %v2106_v19, %v2106_v19 }
0x1702   :  { %2110 = vadd.xlane.f32.xlu0 %v2109_v20 }
0x1703   :  { %v2112_v32 = vsel %vm154_vm4, %v2108_v21, 0.0 }
0x1704   :  { %2113 = vadd.xlane.f32.xlu1 %v2112_v32 }
0x178f   :  { %v2111_v22 = vpop.xlane.xlu0 %2110 }
0x1790   :  { %v2115_v23 = vmul.f32 0.03125, %v2111_v22 }
0x1791   :  { %v2114_v24 = vpop.xlane.xlu1 %2113 }
0x1792   :  { %v2117_v25 = vadd.f32 1e-12, %v2115_v23  ;;  %v2116_v26 = vmul.f32 0.03125, %v2114_v24 }
0x1794   :  { %2935 = vrsqrt.f32 %v2117_v25  ;;  %v2118_v27 = vadd.f32 1e-12, %v2116_v26 }
0x1796   :  { %2937 = vrsqrt.f32 %v2118_v27 }
0x179e   :  { %v2936_v35 = vpop.eup %2935 }
0x179f   :  { %v2121_v36 = vmul.f32 %v2936_v35, %v2105_v17  ;;  %v2233_v17 = vld [vmem:[#allocation3 + $0x124] sm:$0x1] }
0x17a0   :  { %v2938_v37 = vpop.eup %2937  ;;  %v2234_v18 = vunpack.c.l.bf16 %v2233_v17 }
0x17a1   :  { %v2129_v38 = vmul.f32 %v2128_v31, %v2121_v36  ;;  %v2122_v39 = vmul.f32 %v2938_v37, %v2106_v19 }
0x17a2   :  { %v2238_v19 = vrot.slane %v2234_v18, %v3077_v48 }
0x17a3   :  { %v2130_v41 = vmul.f32 %v2128_v31, %v2122_v39  ;;  %v2137_v42 = vadd.f32 %v2136_v40, %v2129_v38  ;;  %v2883_v38 = vld [vmem:[#allocation3 + $0x130] sm:$0xff]   ;;  %v2884_v39 = vld [vmem:[#allocation3 + $0x138] sm:$0xff]  }
0x17a5   :  { %v2138_v43 = vadd.f32 %v2136_v40, %v2130_v41 }
0x17a7   :  { %v2139_v44 = vpack.c.bf16 %v2138_v43, %v2137_v42 }
0x17a9   :  { %2810 = vmatmul.mubr.msk.bf16.vlgmr.msra.gmra.mrb[36].mxu1 %vm154_vm4, %v2139_v44 }
0x17aa   :  { %2829 = vmatprep.mubr.msk.bf16.mxu1 %vm3004_vm0, %v3003_v1  ;;  %2826 = vmatpush3.bf16.msra.mxu1 %v2883_v38 }
0x17ab   :  { %2827 = vmatprep.subr.bf16.mxu1 %v3003_v1 }
0x17ae   :  { %2828 = vmatpush3.bf16.msra.mxu1 %v2884_v39 }
0x17af   :  { %2833 = vmatprep.subr.bf16.mxu1 %v3003_v1 }
0x187c   :  { %v2199_v55 = vpop.f32.mrb[36].mxu1 }
0x187d   :  { %v2200_v60 = vadd.f32 %v2199_v55, %v2149_v54  ;;  %v2811_v56 = vpop.f32.mrb[37].mxu1 }
0x187e   :  { %v2202_v61 = vpop.f32.mrb[38].mxu1 }
0x187f   :  { %v2208_v57 = vmul.f32 0.044715, %v2200_v60  ;;  %v2203_v58 = vadd.f32 %v2202_v61, %v2149_v54  ;;  %v2812_v59 = vpop.f32.mrb[39].mxu1  ;;  %v2206_v10 = vmul.f32 0.5, %v2200_v60 }
0x1881   :  { %v2210_v46 = vmul.f32 %v2208_v57, %v2200_v60  ;;  %v2209_v62 = vmul.f32 0.044715, %v2203_v58  ;;  %v2207_v11 = vmul.f32 0.5, %v2203_v58  ;;  %v2348_v57 = vrot.slane %v2344_v53, %v3077_v48 }
0x1883   :  { %v2212_v63 = vmul.f32 %v2210_v46, %v2200_v60  ;;  %v2211_v0 = vmul.f32 %v2209_v62, %v2203_v58 }
0x1885   :  { %v2214_v2 = vadd.f32 %v2212_v63, %v2200_v60  ;;  %v2213_v3 = vmul.f32 %v2211_v0, %v2203_v58  ;;  %v2885_v63 = vld [vmem:[#allocation3 + $0x144] sm:$0xff]   ;;  %v2886_v0 = vld [vmem:[#allocation3 + $0x14c] sm:$0xff]  }
0x1887   :  { %v2216_v4 = vmul.f32 0.7978846, %v2214_v2  ;;  %v2215_v5 = vadd.f32 %v2213_v3, %v2203_v58  ;;  %v2356_v2 = vld [vmem:[#allocation3 + $0x140] sm:$0x1] }
0x1888   :  { %v2357_v3 = vunpack.c.l.bf16 %v2356_v2 }
0x1889   :  { %2939 = vtanh.f32 %v2216_v4  ;;  %v2217_v6 = vmul.f32 0.7978846, %v2215_v5 }
0x188a   :  { %v2361_v4 = vrot.slane %v2357_v3, %v3077_v48 }
0x188b   :  { %2941 = vtanh.f32 %v2217_v6 }
0x1893   :  { %v2940_v8 = vpop.eup %2939 }
0x1894   :  { %v2220_v12 = vadd.f32 1.0, %v2940_v8 }
0x1895   :  { %v2942_v9 = vpop.eup %2941 }
0x1896   :  { %v2221_v13 = vadd.f32 1.0, %v2942_v9  ;;  %v2222_v14 = vmul.f32 %v2220_v12, %v2206_v10 }
0x1898   :  { %v2223_v15 = vmul.f32 %v2221_v13, %v2207_v11 }
0x189a   :  { %v2224_v16 = vpack.c.bf16 %v2223_v15, %v2222_v14  ;;  %v2425_v15 = vld [vmem:[#allocation3 + $0x154] sm:$0x1] }
0x189c   :  { %2822 = vmatmul.mubr.msk.bf16.vlgmr.msra.gmra.mrb[24].mxu0 %vm1192_vm8, %v2224_v16 }
0x196f   :  { %v2300_v50 = vpop.f32.mrb[24].mxu0 }
0x1970   :  { %v2301_v20 = vadd.f32 %v2300_v50, %v2238_v19  ;;  %v2823_v21 = vpop.f32.mrb[25].mxu0 }
0x1971   :  { %v2303_v32 = vpop.f32.mrb[26].mxu0 }
0x1972   :  { %v2304_v7 = vadd.f32 %v2303_v32, %v2238_v19  ;;  %v2824_v33 = vpop.f32.mrb[27].mxu0  ;;  %v2307_v22 = vadd.f32 %v2301_v20, %v2137_v42 }
0x1974   :  { %v2309_v23 = vsel %vm154_vm4, %v2307_v22, 0.0  ;;  %v2308_v24 = vadd.f32 %v2304_v7, %v2138_v43 }
0x1975   :  { %2310 = vadd.xlane.f32.xlu0 %v2309_v23 }
0x1976   :  { %v2312_v25 = vsel %vm154_vm4, %v2308_v24, 0.0 }
0x1977   :  { %2313 = vadd.xlane.f32.xlu1 %v2312_v25 }
0x1a02   :  { %v2311_v26 = vpop.xlane.xlu0 %2310 }
0x1a03   :  { %v2315_v27 = vmul.f32 0.03125, %v2311_v26 }
0x1a04   :  { %v2314_v28 = vpop.xlane.xlu1 %2313 }
0x1a05   :  { %v2317_v29 = vsub.f32 %v2307_v22, %v2315_v27  ;;  %v2316_v30 = vmul.f32 0.03125, %v2314_v28 }
0x1a07   :  { %v2318_v31 = vsub.f32 %v2308_v24, %v2316_v30  ;;  %v2319_v34 = vmul.f32 %v2317_v29, %v2317_v29 }
0x1a09   :  { %v2321_v35 = vsel %vm154_vm4, %v2319_v34, 0.0  ;;  %v2320_v36 = vmul.f32 %v2318_v31, %v2318_v31 }
0x1a0a   :  { %2322 = vadd.xlane.f32.xlu0 %v2321_v35 }
0x1a0b   :  { %v2324_v37 = vsel %vm154_vm4, %v2320_v36, 0.0 }
0x1a0c   :  { %2325 = vadd.xlane.f32.xlu1 %v2324_v37 }
0x1a97   :  { %v2323_v40 = vpop.xlane.xlu0 %2322 }
0x1a98   :  { %v2327_v41 = vmul.f32 0.03125, %v2323_v40 }
0x1a99   :  { %v2326_v42 = vpop.xlane.xlu1 %2325 }
0x1a9a   :  { %v2329_v43 = vadd.f32 1e-12, %v2327_v41  ;;  %v2328_v44 = vmul.f32 0.03125, %v2326_v42 }
0x1a9c   :  { %2943 = vrsqrt.f32 %v2329_v43  ;;  %v2330_v45 = vadd.f32 1e-12, %v2328_v44 }
0x1a9e   :  { %2945 = vrsqrt.f32 %v2330_v45 }
0x1aa6   :  { %v2944_v54 = vpop.eup %2943 }
0x1aa7   :  { %v2333_v55 = vmul.f32 %v2944_v54, %v2317_v29 }
0x1aa8   :  { %v2946_v60 = vpop.eup %2945 }
0x1aa9   :  { %v2341_v56 = vmul.f32 %v2340_v52, %v2333_v55  ;;  %v2334_v61 = vmul.f32 %v2946_v60, %v2318_v31 }
0x1aab   :  { %v2342_v58 = vmul.f32 %v2340_v52, %v2334_v61  ;;  %v2349_v59 = vadd.f32 %v2348_v57, %v2341_v56 }
0x1aad   :  { %v2350_v46 = vadd.f32 %v2348_v57, %v2342_v58 }
0x1aaf   :  { %v2351_v62 = vpack.c.bf16 %v2350_v46, %v2349_v59 }
0x1ab1   :  { %2830 = vmatmul.mubr.msk.bf16.vlgmr.msra.gmra.mrb[40].mxu1 %vm154_vm4, %v2351_v62 }
0x1ab2   :  { %2837 = vmatprep.mubr.msk.bf16.mxu1 %vm3004_vm0, %v3003_v1  ;;  %2834 = vmatpush3.bf16.msra.mxu1 %v2885_v63 }
0x1ab3   :  { %2835 = vmatprep.subr.bf16.mxu1 %v3003_v1  ;;  %v2426_v1 = vunpack.c.l.bf16 %v2425_v15 }
0x1ab5   :  { %v2430_v16 = vrot.slane %v2426_v1, %v3077_v48 }
0x1ab6   :  { %2836 = vmatpush3.bf16.msra.mxu1 %v2886_v0 }
0x1b84   :  { %v2411_v5 = vpop.f32.mrb[40].mxu1 }
0x1b85   :  { %v2412_v6 = vadd.f32 %v2411_v5, %v2361_v4  ;;  %v2831_v8 = vpop.f32.mrb[41].mxu1 }
0x1b86   :  { %v2414_v12 = vpop.f32.mrb[42].mxu1 }
0x1b87   :  { %v2415_v9 = vadd.f32 %v2414_v12, %v2361_v4  ;;  %v2832_v10 = vpop.f32.mrb[43].mxu1  ;;  %2947 = vtanh.f32 %v2412_v6 }
0x1b89   :  { %2949 = vtanh.f32 %v2415_v9 }
0x1b91   :  { %v2948_v11 = vpop.eup %2947 }
0x1b93   :  { %v2950_v13 = vpop.eup %2949 }
0x1b94   :  { %v2420_v14 = vpack.c.bf16 %v2950_v13, %v2948_v11 }
0x1b96   :  { %2838 = vmatmul.mubr.msk.bf16.vlgmr.msra.gmra.mrb[44].mxu1 %vm154_vm4, %v2420_v14 }
0x1c69   :  { %v2480_v17 = vpop.f32.mrb[44].mxu1 }
0x1c6a   :  { %v2481_v18 = vadd.f32 %v2480_v17, %v2430_v16  ;;  %v2839_v19 = vpop.f32.mrb[45].mxu1 }
0x1c6b   :  { %v2483_v50 = vpop.f32.mrb[46].mxu1 }
0x1c6c   :  { %v2484_v20 = vadd.f32 %v2483_v50, %v2430_v16  ;;  %v2840_v21 = vpop.f32.mrb[47].mxu1  ;;  %2488 = vst.msk [vmem:[#allocation6] sm:$0x1] %vm2487_vm9, %v2481_v18 }
0x1c6e   :  { %2489 = vst.msk [vmem:[#allocation6 + $0x1] sm:$0x1] %vm2487_vm9, %v2484_v20 }
0x1c6f   :  { %2984 = shalt.err (!%p2981_p12)
}
0x1c70   :  { %s2985_s12 = scalar_lea.hbm %s3357_s3, 32 }
0x1c71   :  { %p2986_p13 = scmp.ne.s32.totalorder %s3357_s3, %s2985_s12  ;;  %p2989_p0 = scmp.lt.u32.totalorder %s2985_s12, %s3357_s3 }
0x1c73   :  { %p2991_p1 = pnand %p2989_p0, %p2986_p13 }
0x1c75   :  { %2994 = shalt.err (!%p2991_p1)
}
0x1c76   :  { %2499 = dma.vmem_to_hbm [thread:$0]  %s2497_s8, 32, %s3357_s3, [#allocation5]  }
0x1c77   :  { %2997 = dma.done.wait [#allocation5], 32  }
0x1c78   :  { %2998 = vsyncadd [#allocation5], 4294967264 }
0x1c79   :  { %2503 = vsyncpa [#allocation4], 1 }
0x1c7a   :  { %2504 = vsyncpa [#allocation5], 1 }

</bundles_post_ra>
